<compile_context>
chip_gen: v6e
topology: v6e:2x2x1
jax: 0.10.0
libtpu: 0.0.40
codegen_flags: <defaults>
</compile_context>

<pallas_src>
import functools
import jax
import jax.numpy as jnp
from jax.experimental import pallas as pl
from jax.experimental.pallas import tpu as pltpu


# ----------------------------- Fused PAConv kernel ------------------------------

def _paconv_fused_kernel(x_ref, wcomb_ref, b1_ref, w2_ref, b2_ref,
                         e_ref, s_ref, gamma_ref, beta_ref, o_ref,
                         *, nsample, mc):
    """One row-tile of points (TP points x K neighbors flattened to R rows).

    x_ref    : (R, Cin+3)      bf16  [gathered neighbor features | rel coords]
    wcomb    : (Cin+3, MC+H)   bf16  block-diag [[wbank, 0], [0, scorenet w1]]
    e_ref    : (m, MC)         bf16  0/1 score-expansion matrix
    s_ref    : (MC, Cout)      bf16  0/1 group-sum matrix
    o_ref    : (TP, Cout)      f32   output
    """
    R = x_ref.shape[0]
    TP = R // nsample
    Cout = o_ref.shape[-1]

    # --- One lane-dense bf16 MXU matmul: bank transform + ScoreNet layer 1 ------
    fused = jnp.dot(x_ref[...], wcomb_ref[...],
                    preferred_element_type=jnp.float32)          # (R, MC+H) f32
    trans = fused[:, :mc]                                        # (R, MC)   f32
    h = jnp.maximum(fused[:, mc:] + b1_ref[...], 0.0)            # (R, H)

    # --- ScoreNet layer 2 + softmax over the m weight banks ---------------------
    logits = jnp.dot(h, w2_ref[...], preferred_element_type=jnp.float32) + b2_ref[...]
    logits = logits - jnp.max(logits, axis=-1, keepdims=True)
    ex = jnp.exp(logits)
    inv = pl.reciprocal(jnp.sum(ex, axis=-1, keepdims=True), approx=True)
    scores = (ex * inv).astype(jnp.bfloat16)                     # (R, m) bf16

    # --- Lane-dense score combine (bf16 operands, f32 accumulation) -------------
    # scores_rep[r, j] = scores[r, j // Cout]  via constant 0/1 matmul
    scores_rep = jnp.dot(scores, e_ref[...],
                         preferred_element_type=jnp.float32)     # (R, MC)
    prod = (trans * scores_rep).astype(jnp.bfloat16)             # (R, MC) bf16
    comb = jnp.dot(prod, s_ref[...],
                   preferred_element_type=jnp.float32)           # (R, Cout)

    # --- Max over nsample + affine BN + ReLU ------------------------------------
    # Hard layout assumption: nsample is a multiple of 8 (padded by the wrapper).
    pooled = jnp.max(comb.reshape(TP, nsample, Cout), axis=1)    # (TP, Cout)
    o_ref[...] = jnp.maximum(pooled * gamma_ref[...] + beta_ref[...], 0.0)


# --------------------------- Tiling / VMEM policy ----------------------------

def _vmem_policy():
    """Generation-aware (block budget, vmem_limit_bytes, min grid steps)."""
    try:
        info = pltpu.get_tpu_info()
        cap = int(getattr(info, "vmem_capacity_bytes", 64 << 20))
    except Exception:
        cap = 64 << 20
    if cap >= (100 << 20):
        # v5e / v6e: 128 MiB physical VMEM -> big blocks amortize grid overhead.
        return 80 << 20, 100 << 20, 1
    # v7x-class: 64 MiB physical per TensorCore -> leave headroom for compiler
    # scratch + double buffers, and keep >= 2 grid steps so the parallel axis
    # can shard across both cores.
    return 20 << 20, 52 << 20, 2


def _choose_row_tile(P, bytes_per_point, budget, min_steps=1):
    """Largest point tile (multiple of 8, divisor of P) fitting the VMEM budget."""
    cap_pts = max(8, budget // max(bytes_per_point, 1))
    cands = (4096, 2048, 1024, 512, 256, 128, 64, 32, 16, 8)
    for t in cands:
        if t <= cap_pts and P % t == 0 and P // t >= min_steps:
            return t
    for t in cands:
        if t <= cap_pts and P % t == 0:
            return t
    return P  # full-extent fallback (correct; disables pipelining)


def _lanes(c):
    return ((c + 127) // 128) * 128


# ------------------------------ Kernel wrapper -------------------------------

def paconv_fused(rel, feat_g, p):
    """rel (P, K, 3) f32, feat_g (P, K, Cin) bf16 -> (P, Cout) f32."""
    P, K, _ = rel.shape
    Cin = feat_g.shape[-1]
    H = p["w1"].shape[1]
    m = p["w2"].shape[1]
    MC = p["wbank"].shape[1]
    Cout = MC // m
    assert MC % 128 == 0, "score-expansion slice boundary must be 128-lane aligned"
    assert K % 8 == 0, "nsample must be padded to a multiple of 8"

    # Block-diagonal fused weight: [feat | rel] @ [[wbank, 0], [0, w1]] -> [trans | h]
    wcomb = jnp.zeros((Cin + 3, MC + H), jnp.float32)
    wcomb = wcomb.at[:Cin, :MC].set(p["wbank"])
    wcomb = wcomb.at[Cin:, MC:].set(p["w1"])
    wcomb = wcomb.astype(jnp.bfloat16)

    # Single lane-dense bf16 input block.
    x2d = jnp.concatenate(
        [feat_g, rel.astype(jnp.bfloat16)], axis=-1).reshape(P * K, Cin + 3)

    # Constant 0/1 matrices (exact in bf16) for the lane-dense m-contraction.
    cols = jnp.arange(MC)
    expand = (cols[None, :] // Cout == jnp.arange(m)[:, None]).astype(jnp.bfloat16)  # (m, MC)
    gsum = (cols[:, None] % Cout == jnp.arange(Cout)[None, :]).astype(jnp.bfloat16)  # (MC, Cout)

    # Per-point VMEM working set, counting 128-lane padding of narrow arrays.
    bytes_per_point = (
        2 * K * _lanes(Cin + 3) * 2          # input block bf16, double-buffered
        + K * _lanes(MC + H) * 4             # fused matmul output f32
        + K * _lanes(MC) * 4                 # trans slice f32
        + 2 * K * _lanes(MC) * 2             # scores_rep bf16 + prod bf16
        + 4 * K * _lanes(max(H, m)) * 4      # scorenet chain (h/logits/exp/scores)
        + K * _lanes(Cout) * 4               # comb f32
        + 4 * _lanes(Cout) * 4               # pooled + output (double-buffered)
    )
    budget, vmem_limit, min_steps = _vmem_policy()
    TP = _choose_row_tile(P, bytes_per_point, budget, min_steps)
    RT = TP * K

    kernel = functools.partial(_paconv_fused_kernel, nsample=K, mc=MC)
    return pl.pallas_call(
        kernel,
        out_shape=jax.ShapeDtypeStruct((P, Cout), jnp.float32),
        grid=(P // TP,),
        in_specs=[
            pl.BlockSpec((RT, Cin + 3), lambda i: (i, 0)),       # fused input (bf16)
            pl.BlockSpec((Cin + 3, MC + H), lambda i: (0, 0)),   # block-diag weight (bf16)
            pl.BlockSpec((1, H), lambda i: (0, 0)),              # scorenet b1
            pl.BlockSpec((H, m), lambda i: (0, 0)),              # scorenet w2
            pl.BlockSpec((1, m), lambda i: (0, 0)),              # scorenet b2
            pl.BlockSpec((m, MC), lambda i: (0, 0)),             # score-expansion (bf16)
            pl.BlockSpec((MC, Cout), lambda i: (0, 0)),          # group-sum (bf16)
            pl.BlockSpec((1, Cout), lambda i: (0, 0)),           # bn gamma
            pl.BlockSpec((1, Cout), lambda i: (0, 0)),           # bn beta
        ],
        out_specs=pl.BlockSpec((TP, Cout), lambda i: (i, 0)),
        compiler_params=pltpu.CompilerParams(
            dimension_semantics=("parallel",),
            vmem_limit_bytes=vmem_limit,
        ),
    )(x2d, wcomb, p["b1"], p["w2"], p["b2"], expand, gsum, p["gamma"], p["beta"])


# ------------------------------ JAX glue ops --------------------------------

def furthest_point_sampling(xyz, npoint):
    """xyz: (B, N, 3) -> (B, npoint) int32 indices (starts at index 0, like pointops)."""
    B, N, _ = xyz.shape

    def one(pts):
        def body(i, state):
            idxs, dists, last = state
            d = jnp.sum((pts - pts[last]) ** 2, axis=-1)
            dists = jnp.minimum(dists, d)
            nxt = jnp.argmax(dists).astype(jnp.int32)
            idxs = idxs.at[i].set(nxt)
            return idxs, dists, nxt

        idxs = jnp.zeros((npoint,), jnp.int32)
        dists = jnp.full((N,), 1e10, jnp.float32)
        idxs, _, _ = jax.lax.fori_loop(1, npoint, body, (idxs, dists, jnp.int32(0)))
        return idxs

    return jax.vmap(one)(xyz)


def ball_query_and_group(src_xyz, new_xyz, radius, nsample):
    """Radius ball query (first-in-index-order, pad with first hit) + relative coords.

    src_xyz: (B, N, 3), new_xyz: (B, S, 3)
    returns idx (B, S, nsample) int32, rel (B, S, nsample, 3) = neighbor_xyz - center_xyz
    """
    B, N, _ = src_xyz.shape
    d2 = jnp.sum((new_xyz[:, :, None, :] - src_xyz[:, None, :, :]) ** 2, axis=-1)  # (B,S,N)
    mask = d2 < radius * radius
    ar = jnp.arange(N, dtype=jnp.int32)[None, None, :]
    key = jnp.where(mask, ar, ar + N)
    order = jnp.argsort(key, axis=-1)[:, :, :nsample].astype(jnp.int32)  # (B,S,nsample)
    valid = jnp.take_along_axis(mask, order, axis=-1)
    first = order[:, :, :1]
    idx = jnp.where(valid, order, first)
    grouped = jax.vmap(lambda p, ii: p[ii])(src_xyz, idx)                # (B,S,nsample,3)
    rel = grouped - new_xyz[:, :, None, :]
    return idx, rel


# ----------------------------- PAConv layer ---------------------------------

def paconv_layer(x, idx, rel, p):
    """x: (B, Cin, N) channel-first features; returns (B, Cout, S) channel-first."""
    B, Cin, N = x.shape
    _, S, K = idx.shape
    m = p["w2"].shape[1]            # static (weight shape)
    Cout = p["wbank"].shape[1] // m

    # Pad nsample to a multiple of 8 with the first neighbor (max-pool invariant).
    if K % 8 != 0:
        pad = 8 - K % 8
        idx = jnp.concatenate([idx, jnp.repeat(idx[:, :, :1], pad, axis=2)], axis=2)
        rel = jnp.concatenate([rel, jnp.repeat(rel[:, :, :1, :], pad, axis=2)], axis=2)
        K = K + pad

    # channel-last + bf16 for the HBM-traffic-dominant gathered path
    x_bnc = jnp.transpose(x, (0, 2, 1)).astype(jnp.bfloat16)             # (B, N, Cin)
    # TODO(synk): data-dependent neighbor gather stays in JAX glue (see header note).
    feat_g = jax.vmap(lambda f, ii: f[ii])(x_bnc, idx)                   # (B, S, K, Cin)

    out = paconv_fused(rel.reshape(B * S, K, 3),
                       feat_g.reshape(B * S, K, Cin), p)                 # (B*S, Cout)
    return jnp.transpose(out.reshape(B, S, Cout), (0, 2, 1))             # (B, Cout, S)


# --------------------------- Module forward pass -----------------------------

def pointnet2_sa_module_cuda_forward(xyz, features, params, npoint, radius, nsample):
    """xyz: (B, N0, 3), features: (B, Cin, N0) -> (new_xyz (B,npoint,3), feats (B,Cout,npoint))."""
    fps_idx = furthest_point_sampling(xyz, npoint)                       # (B, npoint)
    new_xyz = jax.vmap(lambda p, i: p[i])(xyz, fps_idx)                  # (B, npoint, 3)

    # use_xyz: prepend coordinates to the features before the first PAConv layer.
    new_features = jnp.concatenate([jnp.transpose(xyz, (0, 2, 1)), features], axis=1)

    # Layer 0 groups on (xyz, new_xyz); every later layer groups on
    # (new_xyz, new_xyz) (the torch code sets xyz = new_xyz), so that grouping
    # is identical across layers >= 1 and computed exactly once.
    idx0, rel0 = ball_query_and_group(xyz, new_xyz, radius, nsample)
    idx1 = rel1 = None
    for j, p in enumerate(params):
        if j == 0:
            idx, rel = idx0, rel0
        else:
            if idx1 is None:
                idx1, rel1 = ball_query_and_group(new_xyz, new_xyz, radius, nsample)
            idx, rel = idx1, rel1
        new_features = paconv_layer(new_features, idx, rel, p)           # (B, Cout_j, npoint)
    # single grouper -> the "concat over scales" is just the single result
    return new_xyz, new_features


def init_params(key, mlp_spec, m=8, score_hidden=16):
    """mlp_spec already includes the +3 for use_xyz, e.g. [7, 32, 32].

    No python ints are stored in the pytree (m / cout are derived from the
    static weight shapes inside the forward) so the dict can be passed through jit.
    """
    params = []
    for j in range(len(mlp_spec) - 1):
        cin, cout = mlp_spec[j], mlp_spec[j + 1]
        key, k1, k2, k3 = jax.random.split(key, 4)
        params.append(dict(
            wbank=(jax.random.normal(k1, (cin, m * cout), jnp.float32) * 0.1),
            w1=(jax.random.normal(k2, (3, score_hidden), jnp.float32) * 0.5),
            b1=jnp.zeros((1, score_hidden), jnp.float32),
            w2=(jax.random.normal(k3, (score_hidden, m), jnp.float32) * 0.5),
            b2=jnp.zeros((1, m), jnp.float32),
            # TODO(synk): BatchNorm batch statistics not reproduced; identity affine used
            # (gamma > 0 required for affine+ReLU to commute with the max over nsample).
            gamma=jnp.ones((1, cout), jnp.float32),
            beta=jnp.zeros((1, cout), jnp.float32),
        ))
    return params


if __name__ == "__main__":
    key = jax.random.PRNGKey(0)
    B, N0, Cin = 2, 64, 4
    npoint, radius, nsample = 16, 0.4, 8
    mlp = [Cin, 32, 32]
    mlp_spec = [mlp[0] + 3] + mlp[1:]   # use_xyz -> [7, 32, 32]

    kx, kf, kp = jax.random.split(key, 3)
    xyz = jax.random.uniform(kx, (B, N0, 3), jnp.float32)                # (B, N0, 3)
    features = jax.random.normal(kf, (B, Cin, N0), jnp.float32)          # (B, Cin, N0)
    params = init_params(kp, mlp_spec)

    fwd = jax.jit(functools.partial(
        pointnet2_sa_module_cuda_forward,
        npoint=npoint, radius=radius, nsample=nsample))
    new_xyz, new_features = fwd(xyz, features, params)
    jax.block_until_ready((new_xyz, new_features))

    assert new_xyz.shape == (B, npoint, 3)
    assert new_features.shape == (B, mlp_spec[-1], npoint)
    assert bool(jnp.all(jnp.isfinite(new_features)))
    print("KERNEL_OK")
</pallas_src>

<mosaic_0001>
module attributes {stable_mosaic.version = 11 : i64} {
  func.func @_paconv_fused_kernel(%arg0: i32, %arg1: memref<128x10xbf16, #tpu.memory_space<vmem>>, %arg2: memref<10x272xbf16, #tpu.memory_space<vmem>>, %arg3: memref<1x16xf32, #tpu.memory_space<vmem>>, %arg4: memref<16x8xf32, #tpu.memory_space<vmem>>, %arg5: memref<1x8xf32, #tpu.memory_space<vmem>>, %arg6: memref<8x256xbf16, #tpu.memory_space<vmem>>, %arg7: memref<256x32xbf16, #tpu.memory_space<vmem>>, %arg8: memref<1x32xf32, #tpu.memory_space<vmem>>, %arg9: memref<1x32xf32, #tpu.memory_space<vmem>>, %arg10: memref<16x32xf32, #tpu.memory_space<vmem>>) attributes {dimension_semantics = [#tpu.dimension_semantics<parallel>], iteration_bounds = array<i64: 2>, scalar_prefetch = 0 : i64, scratch_operands = 0 : i64, tpu.core_type = #tpu.core_type<tc>, window_params = [{transform_indices = @transform_0, window_bounds = array<i64: 128, 10>}, {pipeline_mode = #tpu.pipeline_mode<synchronous>, transform_indices = @transform_1, window_bounds = array<i64: 10, 272>}, {pipeline_mode = #tpu.pipeline_mode<synchronous>, transform_indices = @transform_2, window_bounds = array<i64: 1, 16>}, {pipeline_mode = #tpu.pipeline_mode<synchronous>, transform_indices = @transform_3, window_bounds = array<i64: 16, 8>}, {pipeline_mode = #tpu.pipeline_mode<synchronous>, transform_indices = @transform_4, window_bounds = array<i64: 1, 8>}, {pipeline_mode = #tpu.pipeline_mode<synchronous>, transform_indices = @transform_5, window_bounds = array<i64: 8, 256>}, {pipeline_mode = #tpu.pipeline_mode<synchronous>, transform_indices = @transform_6, window_bounds = array<i64: 256, 32>}, {pipeline_mode = #tpu.pipeline_mode<synchronous>, transform_indices = @transform_7, window_bounds = array<i64: 1, 32>}, {pipeline_mode = #tpu.pipeline_mode<synchronous>, transform_indices = @transform_8, window_bounds = array<i64: 1, 32>}, {transform_indices = @transform_9, window_bounds = array<i64: 16, 32>}]} {
    %c0 = arith.constant 0 : index
    %c0_0 = arith.constant 0 : index
    %0 = vector.load %arg1[%c0, %c0_0] : memref<128x10xbf16, #tpu.memory_space<vmem>>, vector<128x10xbf16>
    %c0_1 = arith.constant 0 : index
    %c0_2 = arith.constant 0 : index
    %1 = vector.load %arg2[%c0_1, %c0_2] : memref<10x272xbf16, #tpu.memory_space<vmem>>, vector<10x272xbf16>
    %cst = arith.constant dense<0.000000e+00> : vector<128x272xf32>
    %2 = tpu.matmul %0, %1, %cst {dimension_numbers = #tpu.dot_dimension_numbers<[1], [0], [0], [1], [0, 0, 1, 1], [], []>} : vector<128x10xbf16>, vector<10x272xbf16>, vector<128x272xf32> -> vector<128x272xf32>
    %3 = vector.extract_strided_slice %2 {offsets = [0, 0], sizes = [128, 256], strides = [1, 1]} : vector<128x272xf32> to vector<128x256xf32>
    %4 = vector.extract_strided_slice %2 {offsets = [0, 256], sizes = [128, 16], strides = [1, 1]} : vector<128x272xf32> to vector<128x16xf32>
    %c0_3 = arith.constant 0 : index
    %c0_4 = arith.constant 0 : index
    %5 = vector.load %arg3[%c0_3, %c0_4] : memref<1x16xf32, #tpu.memory_space<vmem>>, vector<1x16xf32>
    %6 = vector.broadcast %5 : vector<1x16xf32> to vector<128x16xf32>
    %7 = arith.addf %4, %6 : vector<128x16xf32>
    %cst_5 = arith.constant 0.000000e+00 : f32
    %8 = vector.broadcast %cst_5 : f32 to vector<128x16xf32>
    %9 = arith.maximumf %7, %8 : vector<128x16xf32>
    %c0_6 = arith.constant 0 : index
    %c0_7 = arith.constant 0 : index
    %10 = vector.load %arg4[%c0_6, %c0_7] : memref<16x8xf32, #tpu.memory_space<vmem>>, vector<16x8xf32>
    %cst_8 = arith.constant dense<0.000000e+00> : vector<128x8xf32>
    %11 = tpu.matmul %9, %10, %cst_8 {dimension_numbers = #tpu.dot_dimension_numbers<[1], [0], [0], [1], [0, 0, 1, 1], [], []>} : vector<128x16xf32>, vector<16x8xf32>, vector<128x8xf32> -> vector<128x8xf32>
    %c0_9 = arith.constant 0 : index
    %c0_10 = arith.constant 0 : index
    %12 = vector.load %arg5[%c0_9, %c0_10] : memref<1x8xf32, #tpu.memory_space<vmem>>, vector<1x8xf32>
    %13 = vector.broadcast %12 : vector<1x8xf32> to vector<128x8xf32>
    %14 = arith.addf %11, %13 : vector<128x8xf32>
    %cst_11 = arith.constant dense<0xFF800000> : vector<128xf32>
    %15 = vector.multi_reduction <maximumf>, %14, %cst_11 [1] : vector<128x8xf32> to vector<128xf32>
    %16 = vector.shape_cast %15 : vector<128xf32> to vector<128x1xf32>
    %17 = vector.broadcast %16 : vector<128x1xf32> to vector<128x8xf32>
    %18 = arith.subf %14, %17 : vector<128x8xf32>
    %19 = math.exp %18 : vector<128x8xf32>
    %cst_12 = arith.constant dense<0.000000e+00> : vector<128xf32>
    %20 = vector.multi_reduction <add>, %19, %cst_12 [1] : vector<128x8xf32> to vector<128xf32>
    %21 = vector.shape_cast %20 : vector<128xf32> to vector<128x1xf32>
    %22 = tpu.reciprocal %21 {approx = true} : vector<128x1xf32> -> vector<128x1xf32>
    %23 = vector.broadcast %22 : vector<128x1xf32> to vector<128x8xf32>
    %24 = arith.mulf %19, %23 : vector<128x8xf32>
    %25 = arith.truncf %24 : vector<128x8xf32> to vector<128x8xbf16>
    %c0_13 = arith.constant 0 : index
    %c0_14 = arith.constant 0 : index
    %26 = vector.load %arg6[%c0_13, %c0_14] : memref<8x256xbf16, #tpu.memory_space<vmem>>, vector<8x256xbf16>
    %cst_15 = arith.constant dense<0.000000e+00> : vector<128x256xf32>
    %27 = tpu.matmul %25, %26, %cst_15 {dimension_numbers = #tpu.dot_dimension_numbers<[1], [0], [0], [1], [0, 0, 1, 1], [], []>} : vector<128x8xbf16>, vector<8x256xbf16>, vector<128x256xf32> -> vector<128x256xf32>
    %28 = arith.mulf %3, %27 : vector<128x256xf32>
    %29 = arith.truncf %28 : vector<128x256xf32> to vector<128x256xbf16>
    %c0_16 = arith.constant 0 : index
    %c0_17 = arith.constant 0 : index
    %30 = vector.load %arg7[%c0_16, %c0_17] : memref<256x32xbf16, #tpu.memory_space<vmem>>, vector<256x32xbf16>
    %cst_18 = arith.constant dense<0.000000e+00> : vector<128x32xf32>
    %31 = tpu.matmul %29, %30, %cst_18 {dimension_numbers = #tpu.dot_dimension_numbers<[1], [0], [0], [1], [0, 0, 1, 1], [], []>} : vector<128x256xbf16>, vector<256x32xbf16>, vector<128x32xf32> -> vector<128x32xf32>
    %32 = vector.shape_cast %31 : vector<128x32xf32> to vector<16x8x32xf32>
    %cst_19 = arith.constant dense<0xFF800000> : vector<16x32xf32>
    %33 = vector.multi_reduction <maximumf>, %32, %cst_19 [1] : vector<16x8x32xf32> to vector<16x32xf32>
    %c0_20 = arith.constant 0 : index
    %c0_21 = arith.constant 0 : index
    %34 = vector.load %arg8[%c0_20, %c0_21] : memref<1x32xf32, #tpu.memory_space<vmem>>, vector<1x32xf32>
    %35 = vector.broadcast %34 : vector<1x32xf32> to vector<16x32xf32>
    %36 = arith.mulf %33, %35 : vector<16x32xf32>
    %c0_22 = arith.constant 0 : index
    %c0_23 = arith.constant 0 : index
    %37 = vector.load %arg9[%c0_22, %c0_23] : memref<1x32xf32, #tpu.memory_space<vmem>>, vector<1x32xf32>
    %38 = vector.broadcast %37 : vector<1x32xf32> to vector<16x32xf32>
    %39 = arith.addf %36, %38 : vector<16x32xf32>
    %cst_24 = arith.constant 0.000000e+00 : f32
    %40 = vector.broadcast %cst_24 : f32 to vector<16x32xf32>
    %41 = arith.maximumf %39, %40 : vector<16x32xf32>
    %c0_25 = arith.constant 0 : index
    %c0_26 = arith.constant 0 : index
    %42 = vector.load %arg10[%c0_25, %c0_26] : memref<16x32xf32, #tpu.memory_space<vmem>>, vector<16x32xf32>
    tpu.vector_store %arg10[%c0_25, %c0_26], %41 {strides = array<i32>} : memref<16x32xf32, #tpu.memory_space<vmem>>, vector<16x32xf32>,
    return
  }
  func.func @transform_0(%arg0: i32) -> (i32, i32) {
    %c0_i32 = arith.constant 0 : i32
    %c0_i32_0 = arith.constant 0 : i32
    return %arg0, %c0_i32 : i32, i32
  }
  func.func @transform_1(%arg0: i32) -> (i32, i32) {
    %c0_i32 = arith.constant 0 : i32
    %c0_i32_0 = arith.constant 0 : i32
    %c0_i32_1 = arith.constant 0 : i32
    return %c0_i32, %c0_i32_0 : i32, i32
  }
  func.func @transform_2(%arg0: i32) -> (i32, i32) {
    %c0_i32 = arith.constant 0 : i32
    %c0_i32_0 = arith.constant 0 : i32
    %c0_i32_1 = arith.constant 0 : i32
    return %c0_i32, %c0_i32_0 : i32, i32
  }
  func.func @transform_3(%arg0: i32) -> (i32, i32) {
    %c0_i32 = arith.constant 0 : i32
    %c0_i32_0 = arith.constant 0 : i32
    %c0_i32_1 = arith.constant 0 : i32
    return %c0_i32, %c0_i32_0 : i32, i32
  }
  func.func @transform_4(%arg0: i32) -> (i32, i32) {
    %c0_i32 = arith.constant 0 : i32
    %c0_i32_0 = arith.constant 0 : i32
    %c0_i32_1 = arith.constant 0 : i32
    return %c0_i32, %c0_i32_0 : i32, i32
  }
  func.func @transform_5(%arg0: i32) -> (i32, i32) {
    %c0_i32 = arith.constant 0 : i32
    %c0_i32_0 = arith.constant 0 : i32
    %c0_i32_1 = arith.constant 0 : i32
    return %c0_i32, %c0_i32_0 : i32, i32
  }
  func.func @transform_6(%arg0: i32) -> (i32, i32) {
    %c0_i32 = arith.constant 0 : i32
    %c0_i32_0 = arith.constant 0 : i32
    %c0_i32_1 = arith.constant 0 : i32
    return %c0_i32, %c0_i32_0 : i32, i32
  }
  func.func @transform_7(%arg0: i32) -> (i32, i32) {
    %c0_i32 = arith.constant 0 : i32
    %c0_i32_0 = arith.constant 0 : i32
    %c0_i32_1 = arith.constant 0 : i32
    return %c0_i32, %c0_i32_0 : i32, i32
  }
  func.func @transform_8(%arg0: i32) -> (i32, i32) {
    %c0_i32 = arith.constant 0 : i32
    %c0_i32_0 = arith.constant 0 : i32
    %c0_i32_1 = arith.constant 0 : i32
    return %c0_i32, %c0_i32_0 : i32, i32
  }
  func.func @transform_9(%arg0: i32) -> (i32, i32) {
    %c0_i32 = arith.constant 0 : i32
    %c0_i32_0 = arith.constant 0 : i32
    return %arg0, %c0_i32 : i32, i32
  }
}

module attributes {stable_mosaic.version = 11 : i64} {
  func.func @_paconv_fused_kernel(%arg0: i32, %arg1: memref<128x35xbf16, #tpu.memory_space<vmem>>, %arg2: memref<35x272xbf16, #tpu.memory_space<vmem>>, %arg3: memref<1x16xf32, #tpu.memory_space<vmem>>, %arg4: memref<16x8xf32, #tpu.memory_space<vmem>>, %arg5: memref<1x8xf32, #tpu.memory_space<vmem>>, %arg6: memref<8x256xbf16, #tpu.memory_space<vmem>>, %arg7: memref<256x32xbf16, #tpu.memory_space<vmem>>, %arg8: memref<1x32xf32, #tpu.memory_space<vmem>>, %arg9: memref<1x32xf32, #tpu.memory_space<vmem>>, %arg10: memref<16x32xf32, #tpu.memory_space<vmem>>) attributes {dimension_semantics = [#tpu.dimension_semantics<parallel>], iteration_bounds = array<i64: 2>, scalar_prefetch = 0 : i64, scratch_operands = 0 : i64, tpu.core_type = #tpu.core_type<tc>, window_params = [{transform_indices = @transform_0, window_bounds = array<i64: 128, 35>}, {pipeline_mode = #tpu.pipeline_mode<synchronous>, transform_indices = @transform_1, window_bounds = array<i64: 35, 272>}, {pipeline_mode = #tpu.pipeline_mode<synchronous>, transform_indices = @transform_2, window_bounds = array<i64: 1, 16>}, {pipeline_mode = #tpu.pipeline_mode<synchronous>, transform_indices = @transform_3, window_bounds = array<i64: 16, 8>}, {pipeline_mode = #tpu.pipeline_mode<synchronous>, transform_indices = @transform_4, window_bounds = array<i64: 1, 8>}, {pipeline_mode = #tpu.pipeline_mode<synchronous>, transform_indices = @transform_5, window_bounds = array<i64: 8, 256>}, {pipeline_mode = #tpu.pipeline_mode<synchronous>, transform_indices = @transform_6, window_bounds = array<i64: 256, 32>}, {pipeline_mode = #tpu.pipeline_mode<synchronous>, transform_indices = @transform_7, window_bounds = array<i64: 1, 32>}, {pipeline_mode = #tpu.pipeline_mode<synchronous>, transform_indices = @transform_8, window_bounds = array<i64: 1, 32>}, {transform_indices = @transform_9, window_bounds = array<i64: 16, 32>}]} {
    %c0 = arith.constant 0 : index
    %c0_0 = arith.constant 0 : index
    %0 = vector.load %arg1[%c0, %c0_0] : memref<128x35xbf16, #tpu.memory_space<vmem>>, vector<128x35xbf16>
    %c0_1 = arith.constant 0 : index
    %c0_2 = arith.constant 0 : index
    %1 = vector.load %arg2[%c0_1, %c0_2] : memref<35x272xbf16, #tpu.memory_space<vmem>>, vector<35x272xbf16>
    %cst = arith.constant dense<0.000000e+00> : vector<128x272xf32>
    %2 = tpu.matmul %0, %1, %cst {dimension_numbers = #tpu.dot_dimension_numbers<[1], [0], [0], [1], [0, 0, 1, 1], [], []>} : vector<128x35xbf16>, vector<35x272xbf16>, vector<128x272xf32> -> vector<128x272xf32>
    %3 = vector.extract_strided_slice %2 {offsets = [0, 0], sizes = [128, 256], strides = [1, 1]} : vector<128x272xf32> to vector<128x256xf32>
    %4 = vector.extract_strided_slice %2 {offsets = [0, 256], sizes = [128, 16], strides = [1, 1]} : vector<128x272xf32> to vector<128x16xf32>
    %c0_3 = arith.constant 0 : index
    %c0_4 = arith.constant 0 : index
    %5 = vector.load %arg3[%c0_3, %c0_4] : memref<1x16xf32, #tpu.memory_space<vmem>>, vector<1x16xf32>
    %6 = vector.broadcast %5 : vector<1x16xf32> to vector<128x16xf32>
    %7 = arith.addf %4, %6 : vector<128x16xf32>
    %cst_5 = arith.constant 0.000000e+00 : f32
    %8 = vector.broadcast %cst_5 : f32 to vector<128x16xf32>
    %9 = arith.maximumf %7, %8 : vector<128x16xf32>
    %c0_6 = arith.constant 0 : index
    %c0_7 = arith.constant 0 : index
    %10 = vector.load %arg4[%c0_6, %c0_7] : memref<16x8xf32, #tpu.memory_space<vmem>>, vector<16x8xf32>
    %cst_8 = arith.constant dense<0.000000e+00> : vector<128x8xf32>
    %11 = tpu.matmul %9, %10, %cst_8 {dimension_numbers = #tpu.dot_dimension_numbers<[1], [0], [0], [1], [0, 0, 1, 1], [], []>} : vector<128x16xf32>, vector<16x8xf32>, vector<128x8xf32> -> vector<128x8xf32>
    %c0_9 = arith.constant 0 : index
    %c0_10 = arith.constant 0 : index
    %12 = vector.load %arg5[%c0_9, %c0_10] : memref<1x8xf32, #tpu.memory_space<vmem>>, vector<1x8xf32>
    %13 = vector.broadcast %12 : vector<1x8xf32> to vector<128x8xf32>
    %14 = arith.addf %11, %13 : vector<128x8xf32>
    %cst_11 = arith.constant dense<0xFF800000> : vector<128xf32>
    %15 = vector.multi_reduction <maximumf>, %14, %cst_11 [1] : vector<128x8xf32> to vector<128xf32>
    %16 = vector.shape_cast %15 : vector<128xf32> to vector<128x1xf32>
    %17 = vector.broadcast %16 : vector<128x1xf32> to vector<128x8xf32>
    %18 = arith.subf %14, %17 : vector<128x8xf32>
    %19 = math.exp %18 : vector<128x8xf32>
    %cst_12 = arith.constant dense<0.000000e+00> : vector<128xf32>
    %20 = vector.multi_reduction <add>, %19, %cst_12 [1] : vector<128x8xf32> to vector<128xf32>
    %21 = vector.shape_cast %20 : vector<128xf32> to vector<128x1xf32>
    %22 = tpu.reciprocal %21 {approx = true} : vector<128x1xf32> -> vector<128x1xf32>
    %23 = vector.broadcast %22 : vector<128x1xf32> to vector<128x8xf32>
    %24 = arith.mulf %19, %23 : vector<128x8xf32>
    %25 = arith.truncf %24 : vector<128x8xf32> to vector<128x8xbf16>
    %c0_13 = arith.constant 0 : index
    %c0_14 = arith.constant 0 : index
    %26 = vector.load %arg6[%c0_13, %c0_14] : memref<8x256xbf16, #tpu.memory_space<vmem>>, vector<8x256xbf16>
    %cst_15 = arith.constant dense<0.000000e+00> : vector<128x256xf32>
    %27 = tpu.matmul %25, %26, %cst_15 {dimension_numbers = #tpu.dot_dimension_numbers<[1], [0], [0], [1], [0, 0, 1, 1], [], []>} : vector<128x8xbf16>, vector<8x256xbf16>, vector<128x256xf32> -> vector<128x256xf32>
    %28 = arith.mulf %3, %27 : vector<128x256xf32>
    %29 = arith.truncf %28 : vector<128x256xf32> to vector<128x256xbf16>
    %c0_16 = arith.constant 0 : index
    %c0_17 = arith.constant 0 : index
    %30 = vector.load %arg7[%c0_16, %c0_17] : memref<256x32xbf16, #tpu.memory_space<vmem>>, vector<256x32xbf16>
    %cst_18 = arith.constant dense<0.000000e+00> : vector<128x32xf32>
    %31 = tpu.matmul %29, %30, %cst_18 {dimension_numbers = #tpu.dot_dimension_numbers<[1], [0], [0], [1], [0, 0, 1, 1], [], []>} : vector<128x256xbf16>, vector<256x32xbf16>, vector<128x32xf32> -> vector<128x32xf32>
    %32 = vector.shape_cast %31 : vector<128x32xf32> to vector<16x8x32xf32>
    %cst_19 = arith.constant dense<0xFF800000> : vector<16x32xf32>
    %33 = vector.multi_reduction <maximumf>, %32, %cst_19 [1] : vector<16x8x32xf32> to vector<16x32xf32>
    %c0_20 = arith.constant 0 : index
    %c0_21 = arith.constant 0 : index
    %34 = vector.load %arg8[%c0_20, %c0_21] : memref<1x32xf32, #tpu.memory_space<vmem>>, vector<1x32xf32>
    %35 = vector.broadcast %34 : vector<1x32xf32> to vector<16x32xf32>
    %36 = arith.mulf %33, %35 : vector<16x32xf32>
    %c0_22 = arith.constant 0 : index
    %c0_23 = arith.constant 0 : index
    %37 = vector.load %arg9[%c0_22, %c0_23] : memref<1x32xf32, #tpu.memory_space<vmem>>, vector<1x32xf32>
    %38 = vector.broadcast %37 : vector<1x32xf32> to vector<16x32xf32>
    %39 = arith.addf %36, %38 : vector<16x32xf32>
    %cst_24 = arith.constant 0.000000e+00 : f32
    %40 = vector.broadcast %cst_24 : f32 to vector<16x32xf32>
    %41 = arith.maximumf %39, %40 : vector<16x32xf32>
    %c0_25 = arith.constant 0 : index
    %c0_26 = arith.constant 0 : index
    %42 = vector.load %arg10[%c0_25, %c0_26] : memref<16x32xf32, #tpu.memory_space<vmem>>, vector<16x32xf32>
    tpu.vector_store %arg10[%c0_25, %c0_26], %41 {strides = array<i32>} : memref<16x32xf32, #tpu.memory_space<vmem>>, vector<16x32xf32>,
    return
  }
  func.func @transform_0(%arg0: i32) -> (i32, i32) {
    %c0_i32 = arith.constant 0 : i32
    %c0_i32_0 = arith.constant 0 : i32
    return %arg0, %c0_i32 : i32, i32
  }
  func.func @transform_1(%arg0: i32) -> (i32, i32) {
    %c0_i32 = arith.constant 0 : i32
    %c0_i32_0 = arith.constant 0 : i32
    %c0_i32_1 = arith.constant 0 : i32
    return %c0_i32, %c0_i32_0 : i32, i32
  }
  func.func @transform_2(%arg0: i32) -> (i32, i32) {
    %c0_i32 = arith.constant 0 : i32
    %c0_i32_0 = arith.constant 0 : i32
    %c0_i32_1 = arith.constant 0 : i32
    return %c0_i32, %c0_i32_0 : i32, i32
  }
  func.func @transform_3(%arg0: i32) -> (i32, i32) {
    %c0_i32 = arith.constant 0 : i32
    %c0_i32_0 = arith.constant 0 : i32
    %c0_i32_1 = arith.constant 0 : i32
    return %c0_i32, %c0_i32_0 : i32, i32
  }
  func.func @transform_4(%arg0: i32) -> (i32, i32) {
    %c0_i32 = arith.constant 0 : i32
    %c0_i32_0 = arith.constant 0 : i32
    %c0_i32_1 = arith.constant 0 : i32
    return %c0_i32, %c0_i32_0 : i32, i32
  }
  func.func @transform_5(%arg0: i32) -> (i32, i32) {
    %c0_i32 = arith.constant 0 : i32
    %c0_i32_0 = arith.constant 0 : i32
    %c0_i32_1 = arith.constant 0 : i32
    return %c0_i32, %c0_i32_0 : i32, i32
  }
  func.func @transform_6(%arg0: i32) -> (i32, i32) {
    %c0_i32 = arith.constant 0 : i32
    %c0_i32_0 = arith.constant 0 : i32
    %c0_i32_1 = arith.constant 0 : i32
    return %c0_i32, %c0_i32_0 : i32, i32
  }
  func.func @transform_7(%arg0: i32) -> (i32, i32) {
    %c0_i32 = arith.constant 0 : i32
    %c0_i32_0 = arith.constant 0 : i32
    %c0_i32_1 = arith.constant 0 : i32
    return %c0_i32, %c0_i32_0 : i32, i32
  }
  func.func @transform_8(%arg0: i32) -> (i32, i32) {
    %c0_i32 = arith.constant 0 : i32
    %c0_i32_0 = arith.constant 0 : i32
    %c0_i32_1 = arith.constant 0 : i32
    return %c0_i32, %c0_i32_0 : i32, i32
  }
  func.func @transform_9(%arg0: i32) -> (i32, i32) {
    %c0_i32 = arith.constant 0 : i32
    %c0_i32_0 = arith.constant 0 : i32
    return %arg0, %c0_i32 : i32, i32
  }
}

</mosaic_0001>

<bundles_post_ra>
// kernel: custom-call.16
= control target key start
LH: loop header
LB: loop body
LE: loop exit
PB: predicated region body
PF: predicated region fallthrough
CT: control target
= control target key end

     0   :  { %s6_s0 = inlined_call_operand.vmem [shape: f32[2,64], index: 0, kind: output, shape index: {}]  }

// kernel: pointnet2_sa_module_cuda_forward.2
= control target key start
LH: loop header
LB: loop body
LE: loop exit
PB: predicated region body
PF: predicated region fallthrough
CT: control target
= control target key end

     0   :  { %s2177_s30 = smov 0   ;;  %s2660_s0 = inlined_call_operand.vmem [shape: bf16[256,10], index: 0, kind: input, shape index: {}]   ;;  %s2661_s1 = inlined_call_operand.vmem [shape: bf16[10,272], index: 1, kind: input, shape index: {}]   ;;  %s2662_s2 = inlined_call_operand.vmem [shape: f32[1,16], index: 2, kind: input, shape index: {}]   ;;  %s2663_s3 = inlined_call_operand.vmem [shape: f32[16,8], index: 3, kind: input, shape index: {}]   ;;  %s2664_s4 = inlined_call_operand.vmem [shape: f32[1,8], index: 4, kind: input, shape index: {}]   ;;  %s2665_s5 = inlined_call_operand.vmem [shape: bf16[8,256], index: 5, kind: input, shape index: {}]   ;;  %s2666_s6 = inlined_call_operand.vmem [shape: bf16[256,32], index: 6, kind: input, shape index: {}]   ;;  %s2667_s7 = inlined_call_operand.vmem [shape: f32[1,32], index: 7, kind: input, shape index: {}]   ;;  %s2668_s8 = inlined_call_operand.vmem [shape: f32[1,32], index: 8, kind: input, shape index: {}]   ;;  %s2669_s9 = inlined_call_operand.vmem [shape: f32[32,32], index: 9, kind: output, shape index: {}]  }
   0x1 LB: > { %s1791_s10 = sadd.s32 4294967295, %s2124_s30   ;;  %p1795_p0 = scmp.ge.s32.totalorder %s2124_s30, 1  ;;  %s2124_s30 = sphi %s2177_s30, %s19_s30  }
   0x2   : > { %p288_p1 = scmp.lt.s32.totalorder %s2124_s30, 3 }
   0x4   : > { %p289_p2 = pnand %p1795_p0, %p288_p1 }
   0x5   : > { %s1796_s11 = sshll.u32 (!%p289_p2), %s1791_s10, 4 }
   0x6   : > { %292 = sbr.rel (%p289_p2) target bundleno = 1219 (0x4c3), region = 56  ;;  %p325_p3 = scmp.lt.s32.totalorder (!%p289_p2), %s1796_s11, 31 }
   0xb   : > { %vm435_vm0 = vcmask 1044480   ;;  %v2024_v0 = vld [vmem:[%s2661_s1 + $0x8] ss:$12 sps:$4 sm:$0x1f]   ;;  %s2671_s11 = smov (!%p325_p3, %s1796_s11), 31  ;;  %vm410_vm1 = vcmask 80896  }
   0xc   : > { %v695_v1 = vld [vmem:[%s2663_s3 + $0x8] sm:$0xff]  ;;  %2014 = vmatprep.subr.msk.bf16.mxu1 %vm435_vm0, %v2024_v0  ;;  %v443_v2 = vsel %vm435_vm0, %v2024_v0, 0  ;;  %s1797_s16 = sshll.u32 %s2671_s11, 2  ;;  %v694_v4 = vld [vmem:[%s2663_s3] sm:$0xff]  ;;  %vm703_vm2 = vcmask 130048   ;;  %vm897_vm3 = vcmask 64512  }
   0xd   : > { %1969 = vmatpush3.bf16.msra.mxu1 %v443_v2  ;;  %s328_s19 = scalar_lea.vmem %s2660_s0, %s1797_s16  ;;  %v1828_v13 = vld [vmem:[%s2662_s2] ss:$0 sm:$0xff]  ;;  %vm1112_vm4 = vcmask 1043456   ;;  %vm1505_vm5 = vcmask 261120   ;;  %vm1697_vm6 = vcmask 1041409   ;;  %s2594_s11 = sshll.u32 %s1791_s10, 1 }
   0xe   : > { %1986 = vmatprep.subr.mxu1 %v695_v1  ;;  %v2198_v3 = vld [vmem:[%s328_s19] sm:$0xff]   ;;  %v2203_v5 = vld [vmem:[%s328_s19 + $0x8] sm:$0xff]   ;;  %v2207_v6 = vld [vmem:[%s328_s19 + $0x10] sm:$0xff]   ;;  %vm1700_vm7 = vcmask 1042434   ;;  %vm1703_vm8 = vcmask 1043459   ;;  %p331_p4 = scmp.lt.s32.totalorder %s2594_s11, 3 }
   0xf   : > { %1970 = vmatprep.mubr.msk.bf16.mxu1 %vm410_vm1, %v2198_v3  ;;  %v2213_v7 = vld [vmem:[%s328_s19 + $0x18] sm:$0xff]   ;;  %v2215_v8 = vld [vmem:[%s328_s19 + $0x20] sm:$0xff]   ;;  %v2221_v9 = vld [vmem:[%s328_s19 + $0x28] sm:$0xff]   ;;  %vm1706_vm9 = vcmask 1044484   ;;  %vm1709_vm10 = vcmask 1045509   ;;  %vm1712_vm11 = vcmask 1046534  }
  0x10   : > { %1971 = vmatmul.mubr.msk.bf16.vlgmr.msra.gmra.mxu1 %vm410_vm1, %v2203_v5  ;;  %v2223_v10 = vld [vmem:[%s328_s19 + $0x30] sm:$0xff]   ;;  %v2229_v11 = vld [vmem:[%s328_s19 + $0x38] sm:$0xff]   ;;  %v1829_v62 = vld [vmem:[%s2664_s4] ss:$0 sm:$0xff]  ;;  %s2673_s11 = smov (!%p331_p4, %s2594_s11), 3  ;;  %vm1715_vm12 = vcmask 1047559  }
  0x11   : > { %1974 = vmatprep.mubr.msk.bf16.mxu1 %vm410_vm1, %v2207_v6  ;;  %1987 = vmatpush3.msra.mxu1 %v695_v1  ;;  %s1799_s10 = sshll.u32 %s2673_s11, 3 }
  0x12   : > { %1988 = vmatprep.subr.mxu1 %v694_v4  ;;  %s2622_s14 = scalar_lea.vmem %s2669_s9, %s1799_s10 }
  0x13   : > { %1989 = vmatpush3.msra.mxu1 %v694_v4 }
  0x18   : > { %1975 = vmatmul.mubr.msk.bf16.gmra.mxu1 %vm410_vm1, %v2213_v7 }
  0x19   : > { %1978 = vmatprep.mubr.msk.bf16.mxu1 %vm410_vm1, %v2215_v8 }
  0x20   : > { %1979 = vmatmul.mubr.msk.bf16.gmra.mxu1 %vm410_vm1, %v2221_v9 }
  0x21   : > { %1982 = vmatprep.mubr.msk.bf16.mxu1 %vm410_vm1, %v2223_v10 }
  0x28   : > { %1983 = vmatmul.mubr.msk.bf16.gmra.mxu1 %vm410_vm1, %v2229_v11 }
  0xd0   : > { %v1972_v12 = vpop.f32.mrf.mxu1 }
  0xd1   : > { %v664_v18 = vadd.f32 %v1972_v12, %v1828_v13 }
  0xd2   : > { %v592_v14 = vpop.f32.mrf.mxu1 }
  0xd3   : > { %v662_v15 = vadd.f32 %v1828_v13, %v592_v14  ;;  %v680_v24 = vmax.f32 %v664_v18, 0.0 }
  0xd4   : > { %v1973_v16 = vpop.f32.mrf.mxu1 }
  0xd5   : > { %v678_v17 = vmax.f32 %v662_v15, 0.0  ;;  %v665_v22 = vadd.f32 %v1973_v16, %v1828_v13 }
  0xd6   : > { %v595_v19 = vpop.f32.mrf.mxu1 }
  0xd7   : > { %v663_v20 = vadd.f32 %v1828_v13, %v595_v19  ;;  %1990 = vmatprep.mubr.msk.f32.mxu1 %vm703_vm2, %v678_v17  ;;  %v681_v29 = vmax.f32 %v665_v22, 0.0 }
  0xd8   : > { %v1976_v21 = vpop.f32.mrf.mxu1 }
  0xd9   : > { %v679_v23 = vmax.f32 %v663_v20, 0.0  ;;  %v668_v27 = vadd.f32 %v1976_v21, %v1828_v13 }
  0xda   : > { %v608_v25 = vpop.f32.mrf.mxu1 }
  0xdb   : > { %v666_v26 = vadd.f32 %v1828_v13, %v608_v25  ;;  %1991 = vmatmul.mubr.msk.f32.vlgmr.msra.gmra.mxu1 %vm703_vm2, %v679_v23  ;;  %v684_v34 = vmax.f32 %v668_v27, 0.0 }
  0xdc   : > { %v1977_v28 = vpop.f32.mrf.mxu1  ;;  %1993 = vmatprep.mubr.msk.f32.mxu1 %vm703_vm2, %v680_v24 }
  0xdd   : > { %v682_v30 = vmax.f32 %v666_v26, 0.0  ;;  %v669_v32 = vadd.f32 %v1977_v28, %v1828_v13 }
  0xde   : > { %v611_v31 = vpop.f32.mrf.mxu1 }
  0xdf   : > { %v667_v33 = vadd.f32 %v1828_v13, %v611_v31  ;;  %1994 = vmatmul.mubr.msk.f32.gmra.mxu1 %vm703_vm2, %v681_v29  ;;  %v685_v38 = vmax.f32 %v669_v32, 0.0 }
  0xe0   : > { %v1980_v35 = vpop.f32.mrf.mxu1  ;;  %1996 = vmatprep.mubr.msk.f32.mxu1 %vm703_vm2, %v682_v30 }
  0xe1   : > { %v683_v36 = vmax.f32 %v667_v33, 0.0  ;;  %v672_v40 = vadd.f32 %v1980_v35, %v1828_v13 }
  0xe2   : > { %v624_v37 = vpop.f32.mrf.mxu1 }
  0xe3   : > { %v670_v39 = vadd.f32 %v1828_v13, %v624_v37  ;;  %1997 = vmatmul.mubr.msk.f32.gmra.mxu1 %vm703_vm2, %v683_v36  ;;  %v688_v46 = vmax.f32 %v672_v40, 0.0 }
  0xe4   : > { %v1981_v41 = vpop.f32.mrf.mxu1  ;;  %1999 = vmatprep.mubr.msk.f32.mxu1 %vm703_vm2, %v684_v34 }
  0xe5   : > { %v686_v42 = vmax.f32 %v670_v39, 0.0  ;;  %v673_v44 = vadd.f32 %v1981_v41, %v1828_v13 }
  0xe6   : > { %v627_v43 = vpop.f32.mrf.mxu1 }
  0xe7   : > { %v671_v45 = vadd.f32 %v1828_v13, %v627_v43  ;;  %2000 = vmatmul.mubr.msk.f32.gmra.mxu1 %vm703_vm2, %v685_v38  ;;  %v689_v50 = vmax.f32 %v673_v44, 0.0 }
  0xe8   : > { %v1984_v47 = vpop.f32.mrf.mxu1  ;;  %2002 = vmatprep.mubr.msk.f32.mxu1 %vm703_vm2, %v686_v42 }
  0xe9   : > { %v687_v48 = vmax.f32 %v671_v45, 0.0  ;;  %v676_v52 = vadd.f32 %v1984_v47, %v1828_v13 }
  0xea   : > { %v640_v49 = vpop.f32.mrf.mxu1 }
  0xeb   : > { %v674_v51 = vadd.f32 %v1828_v13, %v640_v49  ;;  %2003 = vmatmul.mubr.msk.f32.gmra.mxu1 %vm703_vm2, %v687_v48  ;;  %v692_v58 = vmax.f32 %v676_v52, 0.0 }
  0xec   : > { %v1985_v53 = vpop.f32.mrf.mxu1  ;;  %2005 = vmatprep.mubr.msk.f32.mxu1 %vm703_vm2, %v688_v46 }
  0xed   : > { %v690_v54 = vmax.f32 %v674_v51, 0.0  ;;  %v677_v56 = vadd.f32 %v1985_v53, %v1828_v13 }
  0xee   : > { %v643_v55 = vpop.f32.mrf.mxu1 }
  0xef   : > { %v675_v57 = vadd.f32 %v1828_v13, %v643_v55  ;;  %2006 = vmatmul.mubr.msk.f32.gmra.mxu1 %vm703_vm2, %v689_v50  ;;  %v693_v60 = vmax.f32 %v677_v56, 0.0  ;;  %v2035_v55 = vld [vmem:[%s2661_s1] ss:$12 sps:$4 sm:$0x1f]  }
  0xf0   : > { %2008 = vmatprep.mubr.msk.f32.mxu1 %vm703_vm2, %v690_v54  ;;  %v2033_v54 = vld [vmem:[%s2661_s1 + $0x4] ss:$12 sps:$4 sm:$0x1f]  }
  0xf1   : > { %v691_v59 = vmax.f32 %v675_v57, 0.0  ;;  %v1082_v56 = vld [vmem:[%s2665_s5] sm:$0xff]  ;;  %1811 = vmatprep.subr.msk.bf16.mxu0 %vm435_vm0, %v2033_v54  ;;  %v437_v57 = vsel %vm435_vm0, %v2035_v55, 0 }
  0xf2   : > { %460 = vmatpush1.bf16.msra.mxu0 %v437_v57 }
  0xf3   : > { %2009 = vmatmul.mubr.msk.f32.gmra.mxu1 %vm703_vm2, %v691_v59  ;;  %v1847_v59 = vcombine.high %v1082_v56, %v1082_v56 }
  0xf4   : > { %2011 = vmatprep.mubr.msk.f32.mxu1 %vm703_vm2, %v692_v58  ;;  %v2126_v58 = vmov 0  }
  0xf5   : > { %477 = vmatprep.mubr.bf16.mxu0 %v2126_v58  ;;  %1848 = vmatprep.subr.msk.bf16.mxu0 %vm1112_vm4, %v1847_v59 }
  0xf6   : > { %1812 = vmatmul.mubr.msk.bf16.vlgmr.msra.gmra.mxu0 %vm410_vm1, %v2198_v3 }
  0xf7   : > { %2012 = vmatmul.mubr.msk.f32.gmra.mxu1 %vm703_vm2, %v693_v60  ;;  %v1846_v60 = vcombine.low %v1082_v56, %v1082_v56  ;;  %487 = vmatprep.mubr.bf16.mxu0 %v2126_v58 }
  0xfe   : > { %1813 = vmatmul.mubr.msk.bf16.gmra.mxu0 %vm410_vm1, %v2203_v5 }
  0xff   : > { %497 = vmatprep.mubr.bf16.mxu0 %v2126_v58 }
 0x106   : > { %1814 = vmatmul.mubr.msk.bf16.gmra.mxu0 %vm410_vm1, %v2207_v6 }
 0x107   : > { %507 = vmatprep.mubr.bf16.mxu0 %v2126_v58 }
 0x10e   : > { %1815 = vmatmul.mubr.msk.bf16.gmra.mxu0 %vm410_vm1, %v2213_v7 }
 0x10f   : > { %517 = vmatprep.mubr.bf16.mxu0 %v2126_v58 }
 0x116   : > { %1816 = vmatmul.mubr.msk.bf16.gmra.mxu0 %vm410_vm1, %v2215_v8 }
 0x117   : > { %527 = vmatprep.mubr.bf16.mxu0 %v2126_v58 }
 0x11e   : > { %1817 = vmatmul.mubr.msk.bf16.gmra.mxu0 %vm410_vm1, %v2221_v9 }
 0x11f   : > { %537 = vmatprep.mubr.bf16.mxu0 %v2126_v58 }
 0x126   : > { %1818 = vmatmul.mubr.msk.bf16.gmra.mxu0 %vm410_vm1, %v2223_v10 }
 0x127   : > { %547 = vmatprep.mubr.bf16.mxu0 %v2126_v58 }
 0x12e   : > { %1819 = vmatmul.mubr.msk.bf16.gmra.mxu0 %vm410_vm1, %v2229_v11 }
 0x12f   : > { %1151 = vmatprep.mubr.bf16.mxu0 %v2126_v58 }
 0x19b   : > { %v1992_v61 = vpop.f32.mrf.mxu1 }
 0x19c   : > { %v2257_v2 = vadd.f32 %v1992_v61, %v1829_v62  ;;  %v1114_v61 = vsel %vm1112_vm4, %v1846_v60, 0 }
 0x19d   : > { %v818_v63 = vpop.f32.mrf.mxu1  ;;  %1134 = vmatpush1.bf16.msra.mxu0 %v1114_v61 }
 0x19e   : > { %v2255_v0 = vadd.f32 %v1829_v62, %v818_v63  ;;  %v901_v17 = vsel %vm897_vm3, %v2257_v2, -inf }
 0x19f   : > { %v1995_v1 = vpop.f32.mrf.mxu1 }
 0x1a0   : > { %v898_v4 = vsel %vm897_vm3, %v2255_v0, -inf  ;;  %v2263_v15 = vadd.f32 %v1995_v1, %v1829_v62 }
 0x1a1   : > { %v828_v12 = vpop.f32.mrf.mxu1  ;;  %899 = vmax.xlane.f32.xlu0 %v898_v4 }
 0x1a2   : > { %v2261_v13 = vadd.f32 %v1829_v62, %v828_v12  ;;  %v907_v22 = vsel %vm897_vm3, %v2263_v15, -inf }
 0x1a3   : > { %v1998_v14 = vpop.f32.mrf.mxu1 }
 0x1a4   : > { %v904_v16 = vsel %vm897_vm3, %v2261_v13, -inf  ;;  %v2269_v19 = vadd.f32 %v1998_v14, %v1829_v62 }
 0x1a5   : > { %v838_v18 = vpop.f32.mrf.mxu1  ;;  %905 = vmax.xlane.f32.xlu1 %v904_v16  ;;  %902 = vmax.xlane.f32.xlu0 %v901_v17 }
 0x1a6   : > { %v2271_v20 = vadd.f32 %v1829_v62, %v838_v18  ;;  %v913_v26 = vsel %vm897_vm3, %v2269_v19, -inf }
 0x1a7   : > { %v2001_v21 = vpop.f32.mrf.mxu1 }
 0x1a8   : > { %v910_v23 = vsel %vm897_vm3, %v2271_v20, -inf  ;;  %v2281_v28 = vadd.f32 %v2001_v21, %v1829_v62 }
 0x1a9   : > { %v848_v24 = vpop.f32.mrf.mxu1  ;;  %908 = vmax.xlane.f32.xlu1 %v907_v22  ;;  %911 = vmax.xlane.f32.xlu0 %v910_v23 }
 0x1aa   : > { %v2277_v25 = vadd.f32 %v1829_v62, %v848_v24  ;;  %v919_v34 = vsel %vm897_vm3, %v2281_v28, -inf }
 0x1ab   : > { %v2004_v27 = vpop.f32.mrf.mxu1 }
 0x1ac   : > { %v916_v29 = vsel %vm897_vm3, %v2277_v25, -inf  ;;  %v2285_v31 = vadd.f32 %v2004_v27, %v1829_v62 }
 0x1ad   : > { %v858_v30 = vpop.f32.mrf.mxu1  ;;  %914 = vmax.xlane.f32.xlu1 %v913_v26  ;;  %917 = vmax.xlane.f32.xlu0 %v916_v29 }
 0x1ae   : > { %v2287_v32 = vadd.f32 %v1829_v62, %v858_v30  ;;  %v925_v39 = vsel %vm897_vm3, %v2285_v31, -inf }
 0x1af   : > { %v2007_v33 = vpop.f32.mrf.mxu1 }
 0x1b0   : > { %v922_v35 = vsel %vm897_vm3, %v2287_v32, -inf  ;;  %v2293_v37 = vadd.f32 %v2007_v33, %v1829_v62 }
 0x1b1   : > { %v868_v36 = vpop.f32.mrf.mxu1  ;;  %920 = vmax.xlane.f32.xlu1 %v919_v34  ;;  %923 = vmax.xlane.f32.xlu0 %v922_v35 }
 0x1b2   : > { %v2295_v38 = vadd.f32 %v1829_v62, %v868_v36  ;;  %v931_v45 = vsel %vm897_vm3, %v2293_v37, -inf }
 0x1b3   : > { %v2010_v40 = vpop.f32.mrf.mxu1 }
 0x1b4   : > { %v928_v41 = vsel %vm897_vm3, %v2295_v38, -inf  ;;  %v2301_v43 = vadd.f32 %v2010_v40, %v1829_v62 }
 0x1b5   : > { %926 = vmax.xlane.f32.xlu1 %v925_v39  ;;  %929 = vmax.xlane.f32.xlu0 %v928_v41  ;;  %v878_v42 = vpop.f32.mrf.mxu1 }
 0x1b6   : > { %v2303_v44 = vadd.f32 %v1829_v62, %v878_v42  ;;  %v937_v51 = vsel %vm897_vm3, %v2301_v43, -inf }
 0x1b7   : > { %v2013_v46 = vpop.f32.mrf.mxu1 }
 0x1b8   : > { %v934_v47 = vsel %vm897_vm3, %v2303_v44, -inf  ;;  %v2309_v49 = vadd.f32 %v2013_v46, %v1829_v62 }
 0x1b9   : > { %932 = vmax.xlane.f32.xlu1 %v931_v45  ;;  %v888_v48 = vpop.f32.mrf.mxu1  ;;  %935 = vmax.xlane.f32.xlu0 %v934_v47 }
 0x1ba   : > { %v2311_v50 = vadd.f32 %v1829_v62, %v888_v48  ;;  %v943_v53 = vsel %vm897_vm3, %v2309_v49, -inf }
 0x1bc   : > { %v940_v52 = vsel %vm897_vm3, %v2311_v50, -inf }
 0x1bd   : > { %938 = vmax.xlane.f32.xlu1 %v937_v51  ;;  %941 = vmax.xlane.f32.xlu0 %v940_v52 }
 0x1c1   : > { %944 = vmax.xlane.f32.xlu1 %v943_v53 }
 0x22a   : > { %v900_v3 = vpop.xlane.xlu0 %899 }
 0x22b   : > { %v946_v5 = vsub.f32 %v2255_v0, %v900_v3 }
 0x22d   : > { %v962_v6 = vmul.f32 1.442695, %v946_v5 }
 0x22e   : > { %v906_v7 = vpop.xlane.xlu1 %905  ;;  %v903_v8 = vpop.xlane.xlu0 %902 }
 0x22f   : > { %2054 = vpow2.f32 %v962_v6  ;;  %v948_v9 = vsub.f32 %v2261_v13, %v906_v7  ;;  %v947_v62 = vsub.f32 %v2257_v2, %v903_v8 }
 0x231   : > { %v966_v63 = vmul.f32 1.442695, %v948_v9  ;;  %v964_v10 = vmul.f32 1.442695, %v947_v62 }
 0x232   : > { %v909_v1 = vpop.xlane.xlu1 %908  ;;  %v912_v4 = vpop.xlane.xlu0 %911 }
 0x233   : > { %2056 = vpow2.f32 %v966_v63  ;;  %v949_v11 = vsub.f32 %v2263_v15, %v909_v1  ;;  %v950_v12 = vsub.f32 %v2271_v20, %v912_v4 }
 0x234   : > { %2058 = vpow2.f32 %v964_v10 }
 0x235   : > { %v968_v14 = vmul.f32 1.442695, %v949_v11  ;;  %v970_v0 = vmul.f32 1.442695, %v950_v12 }
 0x236   : > { %v915_v16 = vpop.xlane.xlu1 %914  ;;  %v918_v17 = vpop.xlane.xlu0 %917 }
 0x237   : > { %2060 = vpow2.f32 %v968_v14  ;;  %v951_v18 = vsub.f32 %v2269_v19, %v915_v16  ;;  %v952_v13 = vsub.f32 %v2277_v25, %v918_v17 }
 0x238   : > { %2062 = vpow2.f32 %v970_v0 }
 0x239   : > { %v972_v2 = vmul.f32 1.442695, %v951_v18  ;;  %v974_v21 = vmul.f32 1.442695, %v952_v13  ;;  %v2038_v18 = vld [vmem:[%s2666_s6 + $0x78] sm:$0xff]  }
 0x23a   : > { %v921_v22 = vpop.xlane.xlu1 %920  ;;  %v924_v23 = vpop.xlane.xlu0 %923  ;;  %v2039_v13 = vld [vmem:[%s2666_s6 + $0x38] sm:$0xff]   ;;  %1904 = vmatprep.subr.bf16.mxu1 %v2038_v18 }
 0x23b   : > { %2064 = vpow2.f32 %v972_v2  ;;  %v953_v15 = vsub.f32 %v2281_v28, %v921_v22  ;;  %v954_v20 = vsub.f32 %v2287_v32, %v924_v23  ;;  %v2040_v2 = vld [vmem:[%s2666_s6 + $0x70] sm:$0xff]   ;;  %1905 = vmatpush3.bf16.msra.mxu1 %v2039_v13  ;;  %v2042_v22 = vld [vmem:[%s2666_s6 + $0x68] sm:$0xff]  }
 0x23c   : > { %v2364_v24 = vpop.eup %2054  ;;  %2066 = vpow2.f32 %v974_v21  ;;  %v2041_v21 = vld [vmem:[%s2666_s6 + $0x30] sm:$0xff]   ;;  %1906 = vmatprep.subr.bf16.mxu1 %v2040_v2  ;;  %v2043_v23 = vld [vmem:[%s2666_s6 + $0x28] sm:$0xff]  }
 0x23d   : > { %v976_v26 = vmul.f32 1.442695, %v953_v15  ;;  %v978_v27 = vmul.f32 1.442695, %v954_v20  ;;  %v994_v19 = vsel %vm897_vm3, %v2364_v24, 0.0  ;;  %v2044_v15 = vld [vmem:[%s2666_s6 + $0x60] sm:$0xff]  }
 0x23e   : > { %v927_v29 = vpop.xlane.xlu1 %926  ;;  %v930_v25 = vpop.xlane.xlu0 %929  ;;  %995 = vadd.xlane.f32.xlu0 %v994_v19  ;;  %v2045_v20 = vld [vmem:[%s2666_s6 + $0x20] sm:$0xff]   ;;  %v2048_v19 = vld [vmem:[%s2666_s6 + $0x50] sm:$0xff]  }
 0x23f   : > { %2068 = vpow2.f32 %v976_v26  ;;  %v955_v30 = vsub.f32 %v2285_v31, %v927_v29  ;;  %v956_v33 = vsub.f32 %v2295_v38, %v930_v25  ;;  %1907 = vmatpush3.bf16.msra.mxu1 %v2041_v21  ;;  %v2046_v26 = vld [vmem:[%s2666_s6 + $0x58] sm:$0xff]  }
 0x240   : > { %v2370_v34 = vpop.eup %2056  ;;  %2070 = vpow2.f32 %v978_v27  ;;  %1908 = vmatprep.subr.bf16.mxu1 %v2042_v22  ;;  %v2047_v27 = vld [vmem:[%s2666_s6 + $0x18] sm:$0xff]  }
 0x241   : > { %v2372_v28 = vpop.eup %2058  ;;  %v980_v32 = vmul.f32 1.442695, %v955_v30  ;;  %v982_v35 = vmul.f32 1.442695, %v956_v33  ;;  %v1000_v36 = vsel %vm897_vm3, %v2370_v34, 0.0 }
 0x242   : > { %v933_v39 = vpop.xlane.xlu1 %932  ;;  %v997_v40 = vsel %vm897_vm3, %v2372_v28, 0.0  ;;  %1001 = vadd.xlane.f32.xlu0 %v1000_v36  ;;  %v936_v41 = vpop.xlane.xlu0 %935 }
 0x243   : > { %2072 = vpow2.f32 %v980_v32  ;;  %v957_v31 = vsub.f32 %v2293_v37, %v933_v39  ;;  %998 = vadd.xlane.f32.xlu1 %v997_v40  ;;  %v958_v38 = vsub.f32 %v2303_v44, %v936_v41  ;;  %1909 = vmatpush3.bf16.msra.mxu1 %v2043_v23 }
 0x244   : > { %v2380_v42 = vpop.eup %2060  ;;  %2074 = vpow2.f32 %v982_v35  ;;  %1910 = vmatprep.subr.bf16.mxu1 %v2044_v15 }
 0x245   : > { %v2382_v45 = vpop.eup %2062  ;;  %v984_v46 = vmul.f32 1.442695, %v957_v31  ;;  %v986_v47 = vmul.f32 1.442695, %v958_v38  ;;  %v1003_v48 = vsel %vm897_vm3, %v2380_v42, 0.0 }
 0x246   : > { %v939_v51 = vpop.xlane.xlu1 %938  ;;  %v1006_v52 = vsel %vm897_vm3, %v2382_v45, 0.0  ;;  %v942_v53 = vpop.xlane.xlu0 %941 }
 0x247   : > { %2076 = vpow2.f32 %v984_v46  ;;  %v959_v37 = vsub.f32 %v2301_v43, %v939_v51  ;;  %1004 = vadd.xlane.f32.xlu1 %v1003_v48  ;;  %1007 = vadd.xlane.f32.xlu0 %v1006_v52  ;;  %v960_v44 = vsub.f32 %v2311_v50, %v942_v53 }
 0x248   : > { %v2390_v54 = vpop.eup %2064  ;;  %2078 = vpow2.f32 %v986_v47  ;;  %1911 = vmatpush3.bf16.msra.mxu1 %v2045_v20 }
 0x249   : > { %v2392_v55 = vpop.eup %2066  ;;  %v988_v56 = vmul.f32 1.442695, %v959_v37  ;;  %v990_v57 = vmul.f32 1.442695, %v960_v44  ;;  %v1009_v59 = vsel %vm897_vm3, %v2390_v54, 0.0  ;;  %1912 = vmatprep.subr.bf16.mxu1 %v2046_v26  ;;  %v479_v26 = vpop.f32.mrf.mxu0 }
 0x24a   : > { %v945_v60 = vpop.xlane.xlu1 %944  ;;  %v1012_v61 = vsel %vm897_vm3, %v2392_v55, 0.0 }
 0x24b   : > { %2080 = vpow2.f32 %v988_v56  ;;  %1010 = vadd.xlane.f32.xlu1 %v1009_v59  ;;  %v961_v43 = vsub.f32 %v2309_v49, %v945_v60  ;;  %1013 = vadd.xlane.f32.xlu0 %v1012_v61 }
 0x24c   : > { %v2399_v50 = vpop.eup %2068  ;;  %2082 = vpow2.f32 %v990_v57  ;;  %1913 = vmatpush3.bf16.msra.mxu1 %v2047_v27  ;;  %v2053_v27 = vld [vmem:[%s2666_s6] sm:$0xff]  }
 0x24d   : > { %v2401_v3 = vpop.eup %2070  ;;  %v992_v5 = vmul.f32 1.442695, %v961_v43  ;;  %v1015_v6 = vsel %vm897_vm3, %v2399_v50, 0.0  ;;  %1914 = vmatprep.subr.bf16.mxu1 %v2048_v19 }
 0x24e   : > { %v1018_v7 = vsel %vm897_vm3, %v2401_v3, 0.0 }
 0x24f   : > { %2084 = vpow2.f32 %v992_v5  ;;  %1016 = vadd.xlane.f32.xlu1 %v1015_v6  ;;  %1019 = vadd.xlane.f32.xlu0 %v1018_v7 }
 0x250   : > { %v2407_v8 = vpop.eup %2072 }
 0x251   : > { %v2409_v9 = vpop.eup %2074  ;;  %v1021_v49 = vsel %vm897_vm3, %v2407_v8, 0.0 }
 0x252   : > { %v1024_v62 = vsel %vm897_vm3, %v2409_v9, 0.0 }
 0x253   : > { %1022 = vadd.xlane.f32.xlu1 %v1021_v49  ;;  %1025 = vadd.xlane.f32.xlu0 %v1024_v62 }
 0x254   : > { %v2415_v63 = vpop.eup %2076 }
 0x255   : > { %v2417_v10 = vpop.eup %2078  ;;  %v1027_v1 = vsel %vm897_vm3, %v2415_v63, 0.0 }
 0x256   : > { %v1030_v4 = vsel %vm897_vm3, %v2417_v10, 0.0 }
 0x257   : > { %1028 = vadd.xlane.f32.xlu1 %v1027_v1  ;;  %1031 = vadd.xlane.f32.xlu0 %v1030_v4 }
 0x258   : > { %v2423_v11 = vpop.eup %2080 }
 0x259   : > { %v2425_v12 = vpop.eup %2082  ;;  %v1033_v14 = vsel %vm897_vm3, %v2423_v11, 0.0 }
 0x25a   : > { %v1036_v0 = vsel %vm897_vm3, %v2425_v12, 0.0 }
 0x25b   : > { %1034 = vadd.xlane.f32.xlu1 %v1033_v14  ;;  %1037 = vadd.xlane.f32.xlu0 %v1036_v0 }
 0x25c   : > { %v2431_v16 = vpop.eup %2084 }
 0x25d   : > { %v1039_v17 = vsel %vm897_vm3, %v2431_v16, 0.0 }
 0x25f   : > { %1040 = vadd.xlane.f32.xlu1 %v1039_v17 }
 0x2c7   : > { %v996_v29 = vpop.xlane.xlu0 %995 }
 0x2c8   : > { %2086 = vrcp.f32 %v996_v29 }
 0x2cb   : > { %v1002_v30 = vpop.xlane.xlu0 %1001 }
 0x2cc   : > { %v999_v25 = vpop.xlane.xlu1 %998 }
 0x2cd   : > { %2088 = vrcp.f32 %v999_v25 }
 0x2d0   : > { %v1005_v33 = vpop.xlane.xlu1 %1004  ;;  %v1008_v36 = vpop.xlane.xlu0 %1007 }
 0x2d1   : > { %2090 = vrcp.f32 %v1005_v33 }
 0x2d2   : > { %2092 = vrcp.f32 %v1002_v30 }
 0x2d4   : > { %v1011_v32 = vpop.xlane.xlu1 %1010  ;;  %v1014_v48 = vpop.xlane.xlu0 %1013 }
 0x2d5   : > { %v2087_v35 = vpop.eup %2086  ;;  %2094 = vrcp.f32 %v1011_v32 }
 0x2d6   : > { %v1058_v40 = vmul.f32 %v2087_v35, %v2364_v24  ;;  %2096 = vrcp.f32 %v1008_v36 }
 0x2d8   : > { %v1017_v46 = vpop.xlane.xlu1 %1016  ;;  %v1020_v44 = vpop.xlane.xlu0 %1019 }
 0x2d9   : > { %2098 = vrcp.f32 %v1017_v46 }
 0x2da   : > { %v2089_v39 = vpop.eup %2088  ;;  %2100 = vrcp.f32 %v1014_v48 }
 0x2db   : > { %v1059_v41 = vmul.f32 %v2089_v39, %v2372_v28 }
 0x2dc   : > { %v1023_v37 = vpop.xlane.xlu1 %1022  ;;  %v1026_v61 = vpop.xlane.xlu0 %1025 }
 0x2dd   : > { %v1074_v31 = vpack.c.bf16 %v1059_v41, %v1058_v40  ;;  %2102 = vrcp.f32 %v1023_v37 }
 0x2de   : > { %v2091_v38 = vpop.eup %2090  ;;  %2104 = vrcp.f32 %v1020_v44 }
 0x2df   : > { %1849 = vmatmul.mubr.msk.bf16.vlgmr.msra.gmra.mxu0 %vm897_vm3, %v1074_v31  ;;  %v2093_v47 = vpop.eup %2092  ;;  %v1061_v51 = vmul.f32 %v2091_v38, %v2380_v42 }
 0x2e0   : > { %1161 = vmatprep.mubr.bf16.mxu0 %v2126_v58  ;;  %v1060_v52 = vmul.f32 %v2093_v47, %v2370_v34  ;;  %v1029_v60 = vpop.xlane.xlu1 %1028  ;;  %v1032_v49 = vpop.xlane.xlu0 %1031 }
 0x2e1   : > { %2106 = vrcp.f32 %v1029_v60 }
 0x2e2   : > { %v1075_v53 = vpack.c.bf16 %v1061_v51, %v1060_v52  ;;  %v2095_v24 = vpop.eup %2094  ;;  %2108 = vrcp.f32 %v1026_v61 }
 0x2e3   : > { %v2097_v28 = vpop.eup %2096  ;;  %v1063_v56 = vmul.f32 %v2095_v24, %v2390_v54 }
 0x2e4   : > { %v1062_v57 = vmul.f32 %v2097_v28, %v2382_v45  ;;  %v1035_v7 = vpop.xlane.xlu1 %1034  ;;  %v1038_v0 = vpop.xlane.xlu0 %1037 }
 0x2e5   : > { %2110 = vrcp.f32 %v1035_v7 }
 0x2e6   : > { %v1076_v59 = vpack.c.bf16 %v1063_v56, %v1062_v57  ;;  %v2099_v42 = vpop.eup %2098  ;;  %2112 = vrcp.f32 %v1032_v49 }
 0x2e7   : > { %1850 = vmatmul.mubr.msk.bf16.gmra.mxu0 %vm897_vm3, %v1075_v53  ;;  %v2101_v34 = vpop.eup %2100  ;;  %v1065_v43 = vmul.f32 %v2099_v42, %v2399_v50 }
 0x2e8   : > { %1171 = vmatprep.mubr.bf16.mxu0 %v2126_v58  ;;  %v1064_v5 = vmul.f32 %v2101_v34, %v2392_v55  ;;  %v1041_v14 = vpop.xlane.xlu1 %1040 }
 0x2e9   : > { %2114 = vrcp.f32 %v1041_v14 }
 0x2ea   : > { %v1077_v6 = vpack.c.bf16 %v1065_v43, %v1064_v5  ;;  %v2103_v54 = vpop.eup %2102  ;;  %2116 = vrcp.f32 %v1038_v0 }
 0x2eb   : > { %v2105_v45 = vpop.eup %2104  ;;  %v1067_v62 = vmul.f32 %v2103_v54, %v2407_v8 }
 0x2ec   : > { %v1066_v1 = vmul.f32 %v2105_v45, %v2401_v3 }
 0x2ee   : > { %v1078_v4 = vpack.c.bf16 %v1067_v62, %v1066_v1  ;;  %v2107_v50 = vpop.eup %2106 }
 0x2ef   : > { %1851 = vmatmul.mubr.msk.bf16.gmra.mxu0 %vm897_vm3, %v1076_v59  ;;  %v2109_v55 = vpop.eup %2108  ;;  %v1069_v17 = vmul.f32 %v2107_v50, %v2415_v63 }
 0x2f0   : > { %1181 = vmatprep.mubr.bf16.mxu0 %v2126_v58  ;;  %v1068_v18 = vmul.f32 %v2109_v55, %v2409_v9 }
 0x2f2   : > { %v1079_v13 = vpack.c.bf16 %v1069_v17, %v1068_v18  ;;  %v2111_v8 = vpop.eup %2110 }
 0x2f3   : > { %v2113_v3 = vpop.eup %2112  ;;  %v1071_v2 = vmul.f32 %v2111_v8, %v2423_v11  ;;  %v2049_v11 = vld [vmem:[%s2666_s6 + $0x10] sm:$0xff]  }
 0x2f4   : > { %v1070_v21 = vmul.f32 %v2113_v3, %v2417_v10  ;;  %1915 = vmatpush3.bf16.msra.mxu1 %v2049_v11  ;;  %v2050_v10 = vld [vmem:[%s2666_s6 + $0x48] sm:$0xff]  }
 0x2f5   : > { %1916 = vmatprep.subr.bf16.mxu1 %v2050_v10 }
 0x2f6   : > { %v1080_v22 = vpack.c.bf16 %v1071_v2, %v1070_v21  ;;  %v2115_v23 = vpop.eup %2114 }
 0x2f7   : > { %1852 = vmatmul.mubr.msk.bf16.gmra.mxu0 %vm897_vm3, %v1077_v6  ;;  %v2117_v15 = vpop.eup %2116  ;;  %v1073_v9 = vmul.f32 %v2115_v23, %v2431_v16  ;;  %v481_v16 = vpop.f32.mrf.mxu0 }
 0x2f8   : > { %1191 = vmatprep.mubr.bf16.mxu0 %v2126_v58  ;;  %v1072_v63 = vmul.f32 %v2117_v15, %v2425_v12  ;;  %v2052_v12 = vld [vmem:[%s2666_s6 + $0x40] sm:$0xff]  }
 0x2f9   : > { %v483_v19 = vpop.f32.mrf.mxu0 }
 0x2fa   : > { %v1081_v20 = vpack.c.bf16 %v1073_v9, %v1072_v63 }
 0x2fb   : > { %v485_v29 = vpop.f32.mrf.mxu0 }
 0x2fd   : > { %v489_v25 = vpop.f32.mrf.mxu0 }
 0x2ff   : > { %1853 = vmatmul.mubr.msk.bf16.gmra.mxu0 %vm897_vm3, %v1078_v4  ;;  %v491_v30 = vpop.f32.mrf.mxu0 }
 0x300   : > { %1201 = vmatprep.mubr.bf16.mxu0 %v2126_v58 }
 0x301   : > { %v493_v33 = vpop.f32.mrf.mxu0 }
 0x303   : > { %v495_v32 = vpop.f32.mrf.mxu0 }
 0x305   : > { %v499_v35 = vpop.f32.mrf.mxu0 }
 0x307   : > { %1854 = vmatmul.mubr.msk.bf16.gmra.mxu0 %vm897_vm3, %v1079_v13  ;;  %v501_v36 = vpop.f32.mrf.mxu0 }
 0x308   : > { %1211 = vmatprep.mubr.bf16.mxu0 %v2126_v58 }
 0x309   : > { %v503_v39 = vpop.f32.mrf.mxu0 }
 0x30b   : > { %v505_v40 = vpop.f32.mrf.mxu0 }
 0x30d   : > { %v2514_v41 = vpop.f32.mrf.mxu0 }
 0x30f   : > { %1855 = vmatmul.mubr.msk.bf16.gmra.mxu0 %vm897_vm3, %v1080_v22  ;;  %v511_v31 = vpop.f32.mrf.mxu0 }
 0x310   : > { %1221 = vmatprep.mubr.bf16.mxu0 %v2126_v58  ;;  %v2051_v58 = vld [vmem:[%s2666_s6 + $0x8] sm:$0xff]  }
 0x311   : > { %1917 = vmatpush3.bf16.msra.mxu1 %v2051_v58  ;;  %v513_v38 = vpop.f32.mrf.mxu0 }
 0x312   : > { %1918 = vmatprep.subr.bf16.mxu1 %v2052_v12 }
 0x313   : > { %v515_v46 = vpop.f32.mrf.mxu0 }
 0x315   : > { %1919 = vmatpush3.bf16.msra.mxu1 %v2053_v27  ;;  %v2516_v47 = vpop.f32.mrf.mxu0 }
 0x317   : > { %1856 = vmatmul.mubr.msk.bf16.gmra.mxu0 %vm897_vm3, %v1081_v20  ;;  %v2518_v48 = vpop.f32.mrf.mxu0 }
 0x319   : > { %v2520_v51 = vpop.f32.mrf.mxu0 }
 0x31b   : > { %v2522_v52 = vpop.f32.mrf.mxu0 }
 0x31d   : > { %v2524_v53 = vpop.f32.mrf.mxu0 }
 0x31f   : > { %v2526_v24 = vpop.f32.mrf.mxu0 }
 0x321   : > { %v2528_v37 = vpop.f32.mrf.mxu0 }
 0x323   : > { %v2530_v28 = vpop.f32.mrf.mxu0 }
 0x325   : > { %v2532_v44 = vpop.f32.mrf.mxu0 }
 0x327   : > { %v2534_v56 = vpop.f32.mrf.mxu0 }
 0x329   : > { %v2536_v57 = vpop.f32.mrf.mxu0 }
 0x32b   : > { %v2538_v59 = vpop.f32.mrf.mxu0 }
 0x32d   : > { %v2540_v42 = vpop.f32.mrf.mxu0 }
 0x32f   : > { %v2542_v60 = vpop.f32.mrf.mxu0 }
 0x331   : > { %v2544_v34 = vpop.f32.mrf.mxu0 }
 0x333   : > { %v2546_v61 = vpop.f32.mrf.mxu0 }
 0x39f   : > { %v1153_v43 = vpop.f32.mrf.mxu0 }
 0x3a0   : > { %v1232_v62 = vmul.f32 %v1153_v43, %v479_v26 }
 0x3a1   : > { %v1155_v5 = vpop.f32.mrf.mxu0 }
 0x3a2   : > { %v1233_v45 = vmul.f32 %v1155_v5, %v481_v16 }
 0x3a3   : > { %v1157_v6 = vpop.f32.mrf.mxu0 }
 0x3a4   : > { %v1234_v54 = vmul.f32 %v1157_v6, %v483_v19 }
 0x3a5   : > { %v1159_v7 = vpop.f32.mrf.mxu0 }
 0x3a6   : > { %v1235_v49 = vmul.f32 %v1159_v7, %v485_v29  ;;  %v1264_v50 = vpack.c.bf16 %v1234_v54, %v1232_v62 }
 0x3a7   : > { %v1163_v1 = vpop.f32.mrf.mxu0 }
 0x3a8   : > { %v1265_v4 = vpack.c.bf16 %v1235_v49, %v1233_v45  ;;  %v1236_v8 = vmul.f32 %v1163_v1, %v489_v25 }
 0x3a9   : > { %v1165_v14 = vpop.f32.mrf.mxu0 }
 0x3aa   : > { %1440 = vmatprep.mubr.bf16.mxu1 %v1265_v4  ;;  %v1237_v18 = vmul.f32 %v1165_v14, %v491_v30 }
 0x3ab   : > { %v1167_v55 = vpop.f32.mrf.mxu0  ;;  %1441 = vmatmul.mubr.bf16.vlgmr.msra.gmra.mxu1 %v1264_v50 }
 0x3ac   : > { %v1238_v0 = vmul.f32 %v1167_v55, %v493_v33 }
 0x3ad   : > { %v1169_v17 = vpop.f32.mrf.mxu0 }
 0x3ae   : > { %v1239_v13 = vmul.f32 %v1169_v17, %v495_v32  ;;  %v1266_v21 = vpack.c.bf16 %v1238_v0, %v1236_v8 }
 0x3af   : > { %v1173_v3 = vpop.f32.mrf.mxu0 }
 0x3b0   : > { %v1267_v2 = vpack.c.bf16 %v1239_v13, %v1237_v18  ;;  %v1240_v11 = vmul.f32 %v1173_v3, %v499_v35 }
 0x3b1   : > { %v1175_v22 = vpop.f32.mrf.mxu0 }
 0x3b2   : > { %1448 = vmatprep.mubr.bf16.mxu1 %v1267_v2  ;;  %v1241_v63 = vmul.f32 %v1175_v22, %v501_v36 }
 0x3b3   : > { %v1177_v23 = vpop.f32.mrf.mxu0  ;;  %1449 = vmatmul.mubr.bf16.gmra.mxu1 %v1266_v21 }
 0x3b4   : > { %v1242_v15 = vmul.f32 %v1177_v23, %v503_v39 }
 0x3b5   : > { %v1179_v9 = vpop.f32.mrf.mxu0 }
 0x3b6   : > { %v1243_v20 = vmul.f32 %v1179_v9, %v505_v40  ;;  %v1268_v58 = vpack.c.bf16 %v1242_v15, %v1240_v11 }
 0x3b7   : > { %v1183_v26 = vpop.f32.mrf.mxu0 }
 0x3b8   : > { %v1269_v10 = vpack.c.bf16 %v1243_v20, %v1241_v63  ;;  %v1244_v30 = vmul.f32 %v1183_v26, %v2514_v41 }
 0x3b9   : > { %v1185_v16 = vpop.f32.mrf.mxu0 }
 0x3ba   : > { %1456 = vmatprep.mubr.bf16.mxu1 %v1269_v10  ;;  %v1245_v29 = vmul.f32 %v1185_v16, %v511_v31 }
 0x3bb   : > { %v1187_v12 = vpop.f32.mrf.mxu0  ;;  %1457 = vmatmul.mubr.bf16.gmra.mxu1 %v1268_v58 }
 0x3bc   : > { %v1246_v27 = vmul.f32 %v1187_v12, %v513_v38 }
 0x3bd   : > { %v1189_v19 = vpop.f32.mrf.mxu0 }
 0x3be   : > { %v1247_v25 = vmul.f32 %v1189_v19, %v515_v46  ;;  %v1270_v39 = vpack.c.bf16 %v1246_v27, %v1244_v30 }
 0x3bf   : > { %v1193_v33 = vpop.f32.mrf.mxu0 }
 0x3c0   : > { %v1271_v32 = vpack.c.bf16 %v1247_v25, %v1245_v29  ;;  %v1248_v38 = vmul.f32 %v1193_v33, %v2516_v47 }
 0x3c1   : > { %v1195_v43 = vpop.f32.mrf.mxu0 }
 0x3c2   : > { %1464 = vmatprep.mubr.bf16.mxu1 %v1271_v32  ;;  %v1249_v5 = vmul.f32 %v1195_v43, %v2518_v48 }
 0x3c3   : > { %v1197_v36 = vpop.f32.mrf.mxu0  ;;  %1465 = vmatmul.mubr.bf16.gmra.mxu1 %v1270_v39 }
 0x3c4   : > { %v1250_v35 = vmul.f32 %v1197_v36, %v2520_v51 }
 0x3c5   : > { %v1199_v40 = vpop.f32.mrf.mxu0 }
 0x3c6   : > { %v1251_v6 = vmul.f32 %v1199_v40, %v2522_v52  ;;  %v1272_v54 = vpack.c.bf16 %v1250_v35, %v1248_v38 }
 0x3c7   : > { %v1203_v31 = vpop.f32.mrf.mxu0 }
 0x3c8   : > { %v1273_v46 = vpack.c.bf16 %v1251_v6, %v1249_v5  ;;  %v1252_v48 = vmul.f32 %v1203_v31, %v2524_v53 }
 0x3c9   : > { %v1205_v41 = vpop.f32.mrf.mxu0 }
 0x3ca   : > { %1472 = vmatprep.mubr.bf16.mxu1 %v1273_v46  ;;  %v1253_v62 = vmul.f32 %v1205_v41, %v2526_v24 }
 0x3cb   : > { %v1207_v7 = vpop.f32.mrf.mxu0  ;;  %1473 = vmatmul.mubr.bf16.gmra.mxu1 %v1272_v54 }
 0x3cc   : > { %v1254_v45 = vmul.f32 %v1207_v7, %v2528_v37 }
 0x3cd   : > { %v1209_v49 = vpop.f32.mrf.mxu0 }
 0x3ce   : > { %v1255_v51 = vmul.f32 %v1209_v49, %v2530_v28  ;;  %v1274_v4 = vpack.c.bf16 %v1254_v45, %v1252_v48 }
 0x3cf   : > { %v1213_v1 = vpop.f32.mrf.mxu0 }
 0x3d0   : > { %v1275_v52 = vpack.c.bf16 %v1255_v51, %v1253_v62  ;;  %v1256_v24 = vmul.f32 %v1213_v1, %v2532_v44 }
 0x3d1   : > { %v1215_v47 = vpop.f32.mrf.mxu0 }
 0x3d2   : > { %1480 = vmatprep.mubr.bf16.mxu1 %v1275_v52  ;;  %v1257_v0 = vmul.f32 %v1215_v47, %v2534_v56 }
 0x3d3   : > { %v1217_v50 = vpop.f32.mrf.mxu0  ;;  %1481 = vmatmul.mubr.bf16.gmra.mxu1 %v1274_v4 }
 0x3d4   : > { %v1258_v14 = vmul.f32 %v1217_v50, %v2536_v57 }
 0x3d5   : > { %v1219_v55 = vpop.f32.mrf.mxu0 }
 0x3d6   : > { %v1259_v37 = vmul.f32 %v1219_v55, %v2538_v59  ;;  %v1276_v18 = vpack.c.bf16 %v1258_v14, %v1256_v24 }
 0x3d7   : > { %v1223_v17 = vpop.f32.mrf.mxu0 }
 0x3d8   : > { %v1277_v28 = vpack.c.bf16 %v1259_v37, %v1257_v0  ;;  %v1260_v56 = vmul.f32 %v1223_v17, %v2540_v42  ;;  %v2574_v17 = vld [vmem:[%s2667_s7] ss:$0 sm:$0xff] }
 0x3d9   : > { %v1225_v53 = vpop.f32.mrf.mxu0 }
 0x3da   : > { %1488 = vmatprep.mubr.bf16.mxu1 %v1277_v28  ;;  %v1261_v2 = vmul.f32 %v1225_v53, %v2542_v60 }
 0x3db   : > { %v1227_v13 = vpop.f32.mrf.mxu0  ;;  %1489 = vmatmul.mubr.bf16.gmra.mxu1 %v1276_v18 }
 0x3dc   : > { %v1262_v8 = vmul.f32 %v1227_v13, %v2544_v34 }
 0x3dd   : > { %v1229_v3 = vpop.f32.mrf.mxu0 }
 0x3de   : > { %v1263_v57 = vmul.f32 %v1229_v3, %v2546_v61  ;;  %v1278_v59 = vpack.c.bf16 %v1262_v8, %v1260_v56 }
 0x3e0   : > { %v1279_v21 = vpack.c.bf16 %v1263_v57, %v1261_v2 }
 0x3e2   : > { %1496 = vmatprep.mubr.bf16.mxu1 %v1279_v21 }
 0x3e3   : > { %1497 = vmatmul.mubr.bf16.gmra.mxu1 %v1278_v59 }
 0x46b   : > { %v1920_v44 = vpop.f32.mrf.mxu1 }
 0x46d   : > { %v1921_v22 = vpop.f32.mrf.mxu1 }
 0x46e   : > { %v1922_v23 = vadd.f32 %v1921_v22, %v1920_v44 }
 0x46f   : > { %v1923_v15 = vpop.f32.mrf.mxu1 }
 0x470   : > { %v1506_v34 = vsel %vm1505_vm5, %v1922_v23, -inf  ;;  %v2581_v23 = vld [vmem:[%s2668_s8] ss:$0 sm:$0xff] }
 0x471   : > { %v1924_v9 = vpop.f32.mrf.mxu1  ;;  %v1507_v26 = vrot.slane %v1506_v34, 4 }
 0x472   : > { %v1925_v63 = vadd.f32 %v1924_v9, %v1923_v15 }
 0x473   : > { %v1926_v20 = vpop.f32.mrf.mxu1  ;;  %v1508_v29 = vmax.f32 %v1506_v34, %v1507_v26 }
 0x474   : > { %v1513_v60 = vsel %vm1505_vm5, %v1925_v63, -inf }
 0x475   : > { %v1514_v11 = vrot.slane %v1513_v60, 4  ;;  %v1927_v61 = vpop.f32.mrf.mxu1  ;;  %v1509_v40 = vrot.slane %v1508_v29, 2 }
 0x476   : > { %v1928_v42 = vadd.f32 %v1927_v61, %v1926_v20 }
 0x477   : > { %v1515_v10 = vmax.f32 %v1513_v60, %v1514_v11  ;;  %v1929_v58 = vpop.f32.mrf.mxu1  ;;  %v1510_v45 = vmax.f32 %v1508_v29, %v1509_v40 }
 0x478   : > { %v1520_v16 = vsel %vm1505_vm5, %v1928_v42, -inf }
 0x479   : > { %v1516_v12 = vrot.slane %v1515_v10, 2  ;;  %v1521_v27 = vrot.slane %v1520_v16, 4  ;;  %v1930_v19 = vpop.f32.mrf.mxu1  ;;  %v1511_v0 = vrot.slane %v1510_v45, 1 }
 0x47a   : > { %v1931_v25 = vadd.f32 %v1930_v19, %v1929_v58 }
 0x47b   : > { %v1522_v30 = vmax.f32 %v1520_v16, %v1521_v27  ;;  %v1932_v33 = vpop.f32.mrf.mxu1  ;;  %v1517_v32 = vmax.f32 %v1515_v10, %v1516_v12  ;;  %v1512_v21 = vmax.f32 %v1510_v45, %v1511_v0 }
 0x47c   : > { %v1527_v39 = vsel %vm1505_vm5, %v1931_v25, -inf }
 0x47d   : > { %v1523_v43 = vrot.slane %v1522_v30, 2  ;;  %v1528_v36 = vrot.slane %v1527_v39, 4  ;;  %v1933_v35 = vpop.f32.mrf.mxu1  ;;  %v1518_v46 = vrot.slane %v1517_v32, 1  ;;  %v1625_v58 = vmul.f32 %v2574_v17, %v1512_v21 }
 0x47e   : > { %v1934_v5 = vadd.f32 %v1933_v35, %v1932_v33 }
 0x47f   : > { %v1524_v6 = vmax.f32 %v1522_v30, %v1523_v43  ;;  %v1529_v38 = vmax.f32 %v1527_v39, %v1528_v36  ;;  %v1935_v31 = vpop.f32.mrf.mxu1  ;;  %v1519_v52 = vmax.f32 %v1517_v32, %v1518_v46  ;;  %v1648_v40 = vadd.f32 %v2581_v23, %v1625_v58 }
 0x480   : > { %v1534_v54 = vsel %vm1505_vm5, %v1934_v5, -inf }
 0x481   : > { %v1530_v41 = vrot.slane %v1529_v38, 2  ;;  %v1936_v7 = vpop.f32.mrf.mxu1  ;;  %v1535_v49 = vrot.slane %v1534_v54, 4  ;;  %v1525_v51 = vrot.slane %v1524_v6, 1  ;;  %v1626_v13 = vmul.f32 %v2574_v17, %v1519_v52 }
 0x482   : > { %v1937_v62 = vadd.f32 %v1936_v7, %v1935_v31 }
 0x483   : > { %v1531_v48 = vmax.f32 %v1529_v38, %v1530_v41  ;;  %v1938_v1 = vpop.f32.mrf.mxu1  ;;  %v1536_v4 = vmax.f32 %v1534_v54, %v1535_v49  ;;  %v1526_v28 = vmax.f32 %v1524_v6, %v1525_v51  ;;  %v1649_v34 = vadd.f32 %v2581_v23, %v1626_v13 }
 0x484   : > { %v1541_v47 = vsel %vm1505_vm5, %v1937_v62, -inf }
 0x485   : > { %v1532_v50 = vrot.slane %v1531_v48, 1  ;;  %v1542_v14 = vrot.slane %v1541_v47, 4  ;;  %v1939_v55 = vpop.f32.mrf.mxu1  ;;  %v1537_v37 = vrot.slane %v1536_v4, 2  ;;  %v1627_v15 = vmul.f32 %v2574_v17, %v1526_v28 }
 0x486   : > { %v1940_v24 = vadd.f32 %v1939_v55, %v1938_v1  ;;  %v1665_v30 = vmax.f32 %v1649_v34, 0.0 }
 0x487   : > { %v1543_v18 = vmax.f32 %v1541_v47, %v1542_v14  ;;  %v1941_v53 = vpop.f32.mrf.mxu1  ;;  %v1538_v8 = vmax.f32 %v1536_v4, %v1537_v37  ;;  %v1533_v2 = vmax.f32 %v1531_v48, %v1532_v50  ;;  %v1650_v27 = vadd.f32 %v2581_v23, %v1627_v15 }
 0x488   : > { %v1548_v3 = vsel %vm1505_vm5, %v1940_v24, -inf  ;;  %v1696_v7 = vrot.slane %v1665_v30, 7  ;;  %v1664_v4 = vmax.f32 %v1648_v40, 0.0 }
 0x489   : > { %v1544_v57 = vrot.slane %v1543_v18, 2  ;;  %v1942_v56 = vpop.f32.mrf.mxu1  ;;  %v1539_v59 = vrot.slane %v1538_v8, 1  ;;  %v1549_v44 = vrot.slane %v1548_v3, 4  ;;  %v1628_v61 = vmul.f32 %v2574_v17, %v1533_v2 }
 0x48a   : > { %v1943_v22 = vadd.f32 %v1942_v56, %v1941_v53  ;;  %v1666_v31 = vmax.f32 %v1650_v27, 0.0 }
 0x48b   : > { %v1545_v9 = vmax.f32 %v1543_v18, %v1544_v57  ;;  %v1944_v63 = vpop.f32.mrf.mxu1  ;;  %v1540_v20 = vmax.f32 %v1538_v8, %v1539_v59  ;;  %v1550_v60 = vmax.f32 %v1548_v3, %v1549_v44  ;;  %v1651_v32 = vadd.f32 %v2581_v23, %v1628_v61 }
 0x48c   : > { %v1555_v11 = vsel %vm1505_vm5, %v1943_v22, -inf  ;;  %v1699_v55 = vrot.slane %v1666_v31, 6  ;;  %v1698_v8 = vsel %vm1697_vm6, %v1696_v7, %v1664_v4 }
 0x48d   : > { %v1546_v26 = vrot.slane %v1545_v9, 1  ;;  %v1556_v42 = vrot.slane %v1555_v11, 4  ;;  %v1945_v10 = vpop.f32.mrf.mxu1  ;;  %v1629_v16 = vmul.f32 %v2574_v17, %v1540_v20  ;;  %v1551_v12 = vrot.slane %v1550_v60, 2 }
 0x48e   : > { %v1946_v36 = vadd.f32 %v1945_v10, %v1944_v63  ;;  %v1667_v62 = vmax.f32 %v1651_v32, 0.0  ;;  %v1701_v22 = vsel %vm1700_vm7, %v1699_v55, %v1698_v8 }
 0x48f   : > { %v1547_v19 = vmax.f32 %v1545_v9, %v1546_v26  ;;  %v1557_v29 = vmax.f32 %v1555_v11, %v1556_v42  ;;  %v1947_v25 = vpop.f32.mrf.mxu1  ;;  %v1552_v33 = vmax.f32 %v1550_v60, %v1551_v12  ;;  %v1652_v5 = vadd.f32 %v2581_v23, %v1629_v16 }
 0x490   : > { %v1562_v48 = vsel %vm1505_vm5, %v1946_v36, -inf  ;;  %v1702_v3 = vrot.slane %v1667_v62, 5 }
 0x491   : > { %v1630_v39 = vmul.f32 %v2574_v17, %v1547_v19  ;;  %v1558_v43 = vrot.slane %v1557_v29, 2  ;;  %v1948_v35 = vpop.f32.mrf.mxu1  ;;  %v1553_v6 = vrot.slane %v1552_v33, 1  ;;  %v1668_v47 = vmax.f32 %v1652_v5, 0.0 }
 0x492   : > { %v1949_v38 = vadd.f32 %v1948_v35, %v1947_v25  ;;  %v1563_v53 = vrot.slane %v1562_v48, 4  ;;  %v1704_v26 = vsel %vm1703_vm8, %v1702_v3, %v1701_v22 }
 0x493   : > { %v1653_v46 = vadd.f32 %v2581_v23, %v1630_v39  ;;  %v1559_v54 = vmax.f32 %v1557_v29, %v1558_v43  ;;  %v1950_v41 = vpop.f32.mrf.mxu1  ;;  %v1554_v45 = vmax.f32 %v1552_v33, %v1553_v6  ;;  %v1705_v56 = vrot.slane %v1668_v47, 4 }
 0x494   : > { %v1569_v49 = vsel %vm1505_vm5, %v1949_v38, -inf  ;;  %v1564_v60 = vmax.f32 %v1562_v48, %v1563_v53 }
 0x495   : > { %v1560_v51 = vrot.slane %v1559_v54, 1  ;;  %v1570_v1 = vrot.slane %v1569_v49, 4  ;;  %v1951_v52 = vpop.f32.mrf.mxu1  ;;  %v1631_v50 = vmul.f32 %v2574_v17, %v1554_v45  ;;  %v1669_v0 = vmax.f32 %v1653_v46, 0.0 }
 0x496   : > { %v1952_v14 = vadd.f32 %v1951_v52, %v1950_v41  ;;  %v1707_v16 = vsel %vm1706_vm9, %v1705_v56, %v1704_v26  ;;  %v1565_v39 = vrot.slane %v1564_v60, 2 }
 0x497   : > { %v1561_v37 = vmax.f32 %v1559_v54, %v1560_v51  ;;  %v1571_v24 = vmax.f32 %v1569_v49, %v1570_v1  ;;  %v1953_v28 = vpop.f32.mrf.mxu1  ;;  %v1654_v18 = vadd.f32 %v2581_v23, %v1631_v50  ;;  %v1708_v15 = vrot.slane %v1669_v0, 3 }
 0x498   : > { %v1576_v13 = vsel %vm1505_vm5, %v1952_v14, -inf  ;;  %v1566_v41 = vmax.f32 %v1564_v60, %v1565_v39 }
 0x499   : > { %v1632_v2 = vmul.f32 %v2574_v17, %v1561_v37  ;;  %v1954_v57 = vpop.f32.mrf.mxu1  ;;  %v1670_v21 = vmax.f32 %v1654_v18, 0.0  ;;  %v1577_v59 = vrot.slane %v1576_v13, 4  ;;  %v1572_v63 = vrot.slane %v1571_v24, 2 }
 0x49a   : > { %v1955_v44 = vadd.f32 %v1954_v57, %v1953_v28  ;;  %v1710_v19 = vsel %vm1709_vm10, %v1708_v15, %v1707_v16  ;;  %v1567_v14 = vrot.slane %v1566_v41, 1 }
 0x49b   : > { %v1655_v9 = vadd.f32 %v2581_v23, %v1632_v2  ;;  %v1956_v34 = vpop.f32.mrf.mxu1  ;;  %v1711_v20 = vrot.slane %v1670_v21, 2  ;;  %v1578_v11 = vmax.f32 %v1576_v13, %v1577_v59  ;;  %v1573_v25 = vmax.f32 %v1571_v24, %v1572_v63 }
 0x49c   : > { %v1583_v61 = vsel %vm1505_vm5, %v1955_v44, -inf  ;;  %v1568_v56 = vmax.f32 %v1566_v41, %v1567_v14 }
 0x49d   : > { %v1671_v42 = vmax.f32 %v1655_v9, 0.0  ;;  %v1584_v10 = vrot.slane %v1583_v61, 4  ;;  %v1957_v58 = vpop.f32.mrf.mxu1  ;;  %v1579_v12 = vrot.slane %v1578_v11, 2  ;;  %v1713_v32 = vsel %vm1712_vm11, %v1711_v20, %v1710_v19 }
 0x49e   : > { %v1958_v27 = vadd.f32 %v1957_v58, %v1956_v34  ;;  %v1574_v31 = vrot.slane %v1573_v25, 1  ;;  %v1633_v26 = vmul.f32 %v2574_v17, %v1568_v56 }
 0x49f   : > { %v1714_v29 = vrot.slane %v1671_v42, 1  ;;  %v1585_v30 = vmax.f32 %v1583_v61, %v1584_v10  ;;  %v1959_v33 = vpop.f32.mrf.mxu1  ;;  %v1580_v43 = vmax.f32 %v1578_v11, %v1579_v12 }
 0x4a0   : > { %v1590_v36 = vsel %vm1505_vm5, %v1958_v27, -inf  ;;  %v1575_v4 = vmax.f32 %v1573_v25, %v1574_v31 }
 0x4a1   : > { %v1716_v35 = vsel %vm1715_vm12, %v1714_v29, %v1713_v32  ;;  %v1586_v40 = vrot.slane %v1585_v30, 2  ;;  %v1960_v5 = vpop.f32.mrf.mxu1  ;;  %v1591_v6 = vrot.slane %v1590_v36, 4  ;;  %v1581_v7 = vrot.slane %v1580_v43, 1 }
 0x4a2   : > { %1733 = vst.msk [vmem:[%s2622_s14] sm:$0xff] %vm1505_vm5, %v1716_v35  ;;  %v1961_v38 = vadd.f32 %v1960_v5, %v1959_v33  ;;  %v1634_v3 = vmul.f32 %v2574_v17, %v1575_v4  ;;  %v1656_v32 = vadd.f32 %v2581_v23, %v1633_v26 }
 0x4a3   : > { %v1587_v46 = vmax.f32 %v1585_v30, %v1586_v40  ;;  %v1962_v54 = vpop.f32.mrf.mxu1  ;;  %v1592_v45 = vmax.f32 %v1590_v36, %v1591_v6  ;;  %v1582_v55 = vmax.f32 %v1580_v43, %v1581_v7 }
 0x4a4   : > { %v1597_v49 = vsel %vm1505_vm5, %v1961_v38, -inf  ;;  %v1657_v20 = vadd.f32 %v2581_v23, %v1634_v3 }
 0x4a5   : > { %v1588_v62 = vrot.slane %v1587_v46, 1  ;;  %v1598_v51 = vrot.slane %v1597_v49, 4  ;;  %v1963_v48 = vpop.f32.mrf.mxu1  ;;  %v1593_v1 = vrot.slane %v1592_v45, 2  ;;  %v1635_v21 = vmul.f32 %v2574_v17, %v1582_v55 }
 0x4a6   : > { %v1964_v52 = vadd.f32 %v1963_v48, %v1962_v54  ;;  %v1673_v19 = vmax.f32 %v1657_v20, 0.0 }
 0x4a7   : > { %v1599_v47 = vmax.f32 %v1597_v49, %v1598_v51  ;;  %v1965_v50 = vpop.f32.mrf.mxu1  ;;  %v1594_v0 = vmax.f32 %v1592_v45, %v1593_v1  ;;  %v1589_v24 = vmax.f32 %v1587_v46, %v1588_v62  ;;  %v1658_v42 = vadd.f32 %v2581_v23, %v1635_v21 }
 0x4a8   : > { %v1604_v37 = vsel %vm1505_vm5, %v1964_v52, -inf  ;;  %v1717_v40 = vrot.slane %v1673_v19, 7  ;;  %v1672_v46 = vmax.f32 %v1656_v32, 0.0 }
 0x4a9   : > { %v1600_v28 = vrot.slane %v1599_v47, 2  ;;  %v1605_v18 = vrot.slane %v1604_v37, 4  ;;  %v1966_v53 = vpop.f32.mrf.mxu1  ;;  %v1595_v13 = vrot.slane %v1594_v0, 1  ;;  %v1636_v22 = vmul.f32 %v2574_v17, %v1589_v24 }
 0x4aa   : > { %v1967_v8 = vadd.f32 %v1966_v53, %v1965_v50  ;;  %v1674_v33 = vmax.f32 %v1658_v42, 0.0  ;;  %v1718_v49 = vsel %vm1697_vm6, %v1717_v40, %v1672_v46 }
 0x4ab   : > { %v1601_v2 = vmax.f32 %v1599_v47, %v1600_v28  ;;  %v1606_v57 = vmax.f32 %v1604_v37, %v1605_v18  ;;  %v1596_v59 = vmax.f32 %v1594_v0, %v1595_v13  ;;  %v1659_v10 = vadd.f32 %v2581_v23, %v1636_v22 }
 0x4ac   : > { %v1611_v44 = vsel %vm1505_vm5, %v1967_v8, -inf  ;;  %v1719_v31 = vrot.slane %v1674_v33, 6 }
 0x4ad   : > { %v1602_v15 = vrot.slane %v1601_v2, 1  ;;  %v1607_v9 = vrot.slane %v1606_v57, 2  ;;  %v1612_v63 = vrot.slane %v1611_v44, 4  ;;  %v1637_v34 = vmul.f32 %v2574_v17, %v1596_v59 }
 0x4ae   : > { %v1675_v39 = vmax.f32 %v1659_v10, 0.0  ;;  %v1720_v48 = vsel %vm1700_vm7, %v1719_v31, %v1718_v49 }
 0x4af   : > { %v1603_v60 = vmax.f32 %v1601_v2, %v1602_v15  ;;  %v1608_v11 = vmax.f32 %v1606_v57, %v1607_v9  ;;  %v1613_v61 = vmax.f32 %v1611_v44, %v1612_v63  ;;  %v1660_v27 = vadd.f32 %v2581_v23, %v1637_v34 }
 0x4b0   : > { %v1721_v54 = vrot.slane %v1675_v39, 5 }
 0x4b1   : > { %v1638_v58 = vmul.f32 %v2574_v17, %v1603_v60  ;;  %v1609_v16 = vrot.slane %v1608_v11, 1  ;;  %v1614_v12 = vrot.slane %v1613_v61, 2  ;;  %v1676_v35 = vmax.f32 %v1660_v27, 0.0 }
 0x4b2   : > { %v1722_v52 = vsel %vm1703_vm8, %v1721_v54, %v1720_v48 }
 0x4b3   : > { %v1661_v29 = vadd.f32 %v2581_v23, %v1638_v58  ;;  %v1610_v25 = vmax.f32 %v1608_v11, %v1609_v16  ;;  %v1615_v30 = vmax.f32 %v1613_v61, %v1614_v12  ;;  %v1723_v45 = vrot.slane %v1676_v35, 4 }
 0x4b5   : > { %v1639_v43 = vmul.f32 %v2574_v17, %v1610_v25  ;;  %v1616_v36 = vrot.slane %v1615_v30, 1  ;;  %v1677_v5 = vmax.f32 %v1661_v29, 0.0  ;;  %v1724_v47 = vsel %vm1706_vm9, %v1723_v45, %v1722_v52 }
 0x4b7   : > { %v1662_v6 = vadd.f32 %v2581_v23, %v1639_v43  ;;  %v1617_v38 = vmax.f32 %v1615_v30, %v1616_v36  ;;  %v1725_v62 = vrot.slane %v1677_v5, 3 }
 0x4b9   : > { %v1678_v41 = vmax.f32 %v1662_v6, 0.0  ;;  %v1640_v7 = vmul.f32 %v2574_v17, %v1617_v38  ;;  %v1726_v50 = vsel %vm1709_vm10, %v1725_v62, %v1724_v47 }
 0x4bb   : > { %v1663_v51 = vadd.f32 %v2581_v23, %v1640_v7  ;;  %v1727_v1 = vrot.slane %v1678_v41, 2 }
 0x4bd   : > { %v1679_v4 = vmax.f32 %v1663_v51, 0.0  ;;  %v1728_v55 = vsel %vm1712_vm11, %v1727_v1, %v1726_v50 }
 0x4bf   : > { %v1729_v14 = vrot.slane %v1679_v4, 1 }
 0x4c1   : > { %v1730_v17 = vsel %vm1715_vm12, %v1729_v14, %v1728_v55 }
 0x4c2   : > { %1734 = vst.msk [vmem:[%s2622_s14 + $0x8] sm:$0xff] %vm1505_vm5, %v1730_v17 }
 0x4c3 PF: > { %s19_s30 = sadd.s32 1, %s2124_s30  }
 0x4c4   : > { %p16_p5 = scmp.ge.s32.totalorder %s19_s30, 4  }
 0x4c6   :  { %18 = sbr.rel (!%p16_p5) target bundleno = 1 (0x1), region = 86 }

// kernel: pointnet2_sa_module_cuda_forward.3
= control target key start
LH: loop header
LB: loop body
LE: loop exit
PB: predicated region body
PF: predicated region fallthrough
CT: control target
= control target key end

     0   :  { %14 = vsyncpa [#allocation3], 0  ;;  %s2917_s0 = inlined_call_operand.vmem [shape: bf16[256,35], index: 0, kind: input, shape index: {}]   ;;  %s2918_s1 = inlined_call_operand.vmem [shape: bf16[35,272], index: 1, kind: input, shape index: {}]   ;;  %s2919_s2 = inlined_call_operand.vmem [shape: f32[1,16], index: 2, kind: input, shape index: {}]   ;;  %s2920_s3 = inlined_call_operand.vmem [shape: f32[16,8], index: 3, kind: input, shape index: {}]   ;;  %s2921_s4 = inlined_call_operand.vmem [shape: f32[1,8], index: 4, kind: input, shape index: {}]   ;;  %s2922_s5 = inlined_call_operand.vmem [shape: bf16[8,256], index: 5, kind: input, shape index: {}]   ;;  %s2923_s6 = inlined_call_operand.vmem [shape: bf16[256,32], index: 6, kind: input, shape index: {}]   ;;  %s2924_s7 = inlined_call_operand.vmem [shape: f32[1,32], index: 7, kind: input, shape index: {}]   ;;  %s2925_s8 = inlined_call_operand.vmem [shape: f32[1,32], index: 8, kind: input, shape index: {}]   ;;  %s2926_s9 = inlined_call_operand.hbm [shape: f32[32,32], index: 9, kind: output, shape index: {}]  }
   0x1   :  { %16 = vsyncpa [#allocation3 + $0x1], 0  ;;  %s2342_s30 = smov 0   ;;  %s2344_s10 = smov 0  }
   0x2   :  { %s2346_s11 = smov 0   ;;  %s2348_s12 = smov 0  }
   0x3 LB: > { %s2363_s13 = sadd.s32 4294967295, %s2285_s12   ;;  %s1845_s14 = sadd.s32 4294967294, %s2285_s12   ;;  %s2285_s12 = sphi %s2348_s12, %s2932_s12   ;;  %s2281_s11 = sphi %s2346_s11, %s2931_s11   ;;  %s2277_s10 = sphi %s2344_s10, %s2930_s10   ;;  %s2273_s30 = sphi %s2342_s30, %s2929_s30  }
   0x4   : > { %s2367_s15 = sadd.s32 1, %s2285_s12   ;;  %s223_s16 = sadd.s32 1, %s2281_s11 }
   0x5   : > { %s220_s17 = ssub.s32 %s2285_s12, %s2367_s15  ;;  %p233_p0 = scmp.ne.s32.totalorder %s2281_s11, %s2277_s10 }
   0x6   : > { %p221_p1 = scmp.eq.s32.totalorder %s220_s17, 0  ;;  %p234_p2 = scmp.eq.s32.totalorder %s2363_s13, 1 }
   0x7   : > { %p239_p3 = scmp.ne.s32.totalorder %s2277_s10, %s2273_s30  ;;  %p240_p4 = scmp.eq.s32.totalorder %s1845_s14, 1 }
   0x8   : > { %s2378_s18 = scalar_select %p221_p1, %s2281_s11, %s223_s16  }
   0x9   : > { %p2380_p5 = por %p234_p2, %p233_p0  ;;  %p2384_p6 = por %p240_p4, %p239_p3 }
   0xa   : > { %p1848_p7 = scmp.ge.s32.totalorder %s2285_s12, 1  ;;  %p291_p8 = scmp.lt.s32.totalorder %s2285_s12, 3 }
   0xc   : > { %p292_p9 = pnand %p1848_p7, %p291_p8 }
   0xd   : > { %s1850_s23 = sshll.u32 (!%p292_p9), %s2363_s13, 4  ;;  %s2289_s25 = smov (!%p292_p9), [#allocation2]  }
   0xe   : > { %295 = sbr.rel (%p292_p9) target bundleno = 1252 (0x4e4), region = 56  ;;  %p328_p10 = scmp.lt.s32.totalorder (!%p292_p9), %s1850_s23, 31 }
   0xf   : > { %s2229_s26 = sshll.u32 (!%p292_p9), %s2289_s25, 4  ;;  %s2230_s26 = int_to_ptr.vmem [resolvable:$false] %s2229_s26 }
  0x10   : > { %s2231_s27 = scalar_lea.vmem (!%p292_p9), %s2230_s26, 512 }
  0x13   : > { %v2124_v0 = vld [vmem:[%s2918_s1 + $0x38] ss:$0 sps:$4 sm:$0x33]   ;;  %vm466_vm0 = vcmask 1040384   ;;  %vm467_vm1 = vcmask 1041408   ;;  %v2287_v1 = vmov 65535  }
  0x14   : > { %v468_v2 = vsel %vm466_vm0, 4294967295, %v2287_v1  ;;  %v2125_v5 = vld [vmem:[%s2918_s1 + $0x20] ss:$12 sps:$4 sm:$0xff]   ;;  %s2934_s23 = smov (!%p328_p10, %s1850_s23), 31  ;;  %v2126_v6 = vld [vmem:[%s2918_s1 + $0x8] ss:$12 sps:$4 sm:$0xff]  }
  0x15   : > { %v2394_v3 = vsel %vm467_vm1, %v468_v2, 0  ;;  %s1851_s28 = sshll.u32 %s2934_s23, 2  ;;  %vm441_vm2 = vcmask 285696   ;;  %v729_v8 = vld [vmem:[%s2920_s3 + $0x8] sm:$0xff]  ;;  %v728_v11 = vld [vmem:[%s2920_s3] sm:$0xff]  ;;  %vm737_vm3 = vcmask 130048  }
  0x16   : > { %v477_v4 = vand.u32 %v2124_v0, %v2394_v3  ;;  %s331_s16 = scalar_lea.vmem %s2917_s0, %s1851_s28  ;;  %v1885_v18 = vld [vmem:[%s2919_s2] ss:$0 sm:$0xff]  ;;  %vm931_vm4 = vcmask 64512   ;;  %vm1146_vm5 = vcmask 1043456   ;;  %vm1539_vm6 = vcmask 261120   ;;  %s324_s28 = sand.u32 1, %s2277_s10  }
  0x17   : > { %v2406_v7 = vld [vmem:[%s331_s16] sm:$0xff]   ;;  %v2413_v9 = vld [vmem:[%s331_s16 + $0x8] sm:$0xff]   ;;  %v2415_v10 = vld [vmem:[%s331_s16 + $0x10] sm:$0xff]   ;;  %vm1731_vm7 = vcmask 1041409   ;;  %vm1734_vm8 = vcmask 1042434   ;;  %vm1737_vm9 = vcmask 1043459  }
  0x18   : > { %2031 = vmatprep.subr.bf16.mxu1 %v477_v4  ;;  %2037 = vmatprep.mubr.msk.bf16.mxu1 %vm441_vm2, %v2406_v7  ;;  %v2424_v12 = vld [vmem:[%s331_s16 + $0x18] sm:$0xff]   ;;  %v2426_v13 = vld [vmem:[%s331_s16 + $0x20] sm:$0xff]   ;;  %v2432_v14 = vld [vmem:[%s331_s16 + $0x28] sm:$0xff]   ;;  %vm1740_vm10 = vcmask 1044484   ;;  %vm1743_vm11 = vcmask 1045509   ;;  %vm1746_vm12 = vcmask 1046534  }
  0x19   : > { %2032 = vmatpush3.bf16.msra.mxu1 %v477_v4  ;;  %v2434_v15 = vld [vmem:[%s331_s16 + $0x30] sm:$0xff]   ;;  %v2440_v16 = vld [vmem:[%s331_s16 + $0x38] sm:$0xff]   ;;  %v1886_v4 = vld [vmem:[%s2921_s4] ss:$0 sm:$0xff]  ;;  %s1849_s29 = sshll.u32 %s324_s28, 4  ;;  %vm1749_vm13 = vcmask 1047559  }
  0x1a   : > { %2033 = vmatprep.subr.bf16.mxu1 %v2125_v5  ;;  %s2834_s14 = scalar_lea.vmem [#allocation2], %s1849_s29  ;;  %s1937_s16 = sshll.u32 %s2363_s13, 8 }
  0x1b   : > { %s1783_s17 = sshll.u32 %s2834_s14, 4  ;;  %s2867_s23 = scalar_lea.hbm %s2926_s9, %s1937_s16  ;;  %s2869_s17 = int_to_ptr.vmem [resolvable:$true] %s1783_s17 }
  0x1c   : > { %s2877_s13 = scalar_lea.sflag [#allocation3], %s324_s28  ;;  %s2225_s24 = scalar_lea.vmem %s2869_s17, 256 }
  0x1d   : > { %2034 = vmatpush3.bf16.msra.mxu1 %v2125_v5  ;;  %p2226_p11 = scmp.ne.s32.totalorder %s2869_s17, %s2225_s24  ;;  %p2232_p0 = scmp.lt.s32.totalorder %s2869_s17, %s2230_s26 }
  0x1e   : > { %2035 = vmatprep.subr.bf16.mxu1 %v2126_v6  ;;  %p2233_p1 = scmp.lt.s32.totalorder %s2231_s27, %s2225_s24 }
  0x1f   : > { %p2227_p12 = pnand %p2226_p11, %p2380_p5 }
  0x20   : > { %p2234_p2 = por %p2233_p1, %p2232_p0 }
  0x21   : > { %2036 = vmatpush3.bf16.msra.mxu1 %v2126_v6  ;;  %p2228_p13 = pneg %p2227_p12 }
  0x22   : > { %2053 = vmatprep.subr.mxu1 %v729_v8 }
  0x23   : > { %p2235_p3 = pnand %p2234_p2, %p2228_p13 }
  0x24   : > { %2038 = vmatmul.mubr.msk.bf16.vlgmr.msra.gmra.mxu1 %vm441_vm2, %v2413_v9 }
  0x25   : > { %2041 = vmatprep.mubr.msk.bf16.mxu1 %vm441_vm2, %v2415_v10  ;;  %2054 = vmatpush3.msra.mxu1 %v729_v8 }
  0x26   : > { %2055 = vmatprep.subr.mxu1 %v728_v11 }
  0x27   : > { %2056 = vmatpush3.msra.mxu1 %v728_v11 }
  0x2c   : > { %2042 = vmatmul.mubr.msk.bf16.gmra.mxu1 %vm441_vm2, %v2424_v12 }
  0x2d   : > { %2045 = vmatprep.mubr.msk.bf16.mxu1 %vm441_vm2, %v2426_v13 }
  0x34   : > { %2046 = vmatmul.mubr.msk.bf16.gmra.mxu1 %vm441_vm2, %v2432_v14 }
  0x35   : > { %2049 = vmatprep.mubr.msk.bf16.mxu1 %vm441_vm2, %v2434_v15 }
  0x3c   : > { %2050 = vmatmul.mubr.msk.bf16.gmra.mxu1 %vm441_vm2, %v2440_v16 }
  0xe4   : > { %v2039_v17 = vpop.f32.mrf.mxu1 }
  0xe5   : > { %v698_v23 = vadd.f32 %v2039_v17, %v1885_v18 }
  0xe6   : > { %v626_v19 = vpop.f32.mrf.mxu1 }
  0xe7   : > { %v696_v20 = vadd.f32 %v1885_v18, %v626_v19  ;;  %v714_v29 = vmax.f32 %v698_v23, 0.0 }
  0xe8   : > { %v2040_v21 = vpop.f32.mrf.mxu1 }
  0xe9   : > { %v712_v22 = vmax.f32 %v696_v20, 0.0  ;;  %v699_v27 = vadd.f32 %v2040_v21, %v1885_v18 }
  0xea   : > { %v629_v24 = vpop.f32.mrf.mxu1 }
  0xeb   : > { %v697_v25 = vadd.f32 %v1885_v18, %v629_v24  ;;  %2057 = vmatprep.mubr.msk.f32.mxu1 %vm737_vm3, %v712_v22  ;;  %v715_v34 = vmax.f32 %v699_v27, 0.0 }
  0xec   : > { %v2043_v26 = vpop.f32.mrf.mxu1 }
  0xed   : > { %v713_v28 = vmax.f32 %v697_v25, 0.0  ;;  %v702_v32 = vadd.f32 %v2043_v26, %v1885_v18 }
  0xee   : > { %v642_v30 = vpop.f32.mrf.mxu1 }
  0xef   : > { %v700_v31 = vadd.f32 %v1885_v18, %v642_v30  ;;  %2058 = vmatmul.mubr.msk.f32.vlgmr.msra.gmra.mxu1 %vm737_vm3, %v713_v28  ;;  %v718_v39 = vmax.f32 %v702_v32, 0.0 }
  0xf0   : > { %v2044_v33 = vpop.f32.mrf.mxu1  ;;  %2060 = vmatprep.mubr.msk.f32.mxu1 %vm737_vm3, %v714_v29 }
  0xf1   : > { %v716_v35 = vmax.f32 %v700_v31, 0.0  ;;  %v703_v37 = vadd.f32 %v2044_v33, %v1885_v18 }
  0xf2   : > { %v645_v36 = vpop.f32.mrf.mxu1 }
  0xf3   : > { %v701_v38 = vadd.f32 %v1885_v18, %v645_v36  ;;  %2061 = vmatmul.mubr.msk.f32.gmra.mxu1 %vm737_vm3, %v715_v34  ;;  %v719_v43 = vmax.f32 %v703_v37, 0.0 }
  0xf4   : > { %v2047_v40 = vpop.f32.mrf.mxu1  ;;  %2063 = vmatprep.mubr.msk.f32.mxu1 %vm737_vm3, %v716_v35 }
  0xf5   : > { %v717_v41 = vmax.f32 %v701_v38, 0.0  ;;  %v706_v45 = vadd.f32 %v2047_v40, %v1885_v18 }
  0xf6   : > { %v658_v42 = vpop.f32.mrf.mxu1 }
  0xf7   : > { %v704_v44 = vadd.f32 %v1885_v18, %v658_v42  ;;  %2064 = vmatmul.mubr.msk.f32.gmra.mxu1 %vm737_vm3, %v717_v41  ;;  %v722_v51 = vmax.f32 %v706_v45, 0.0 }
  0xf8   : > { %v2048_v46 = vpop.f32.mrf.mxu1  ;;  %2066 = vmatprep.mubr.msk.f32.mxu1 %vm737_vm3, %v718_v39 }
  0xf9   : > { %v720_v47 = vmax.f32 %v704_v44, 0.0  ;;  %v707_v49 = vadd.f32 %v2048_v46, %v1885_v18 }
  0xfa   : > { %v661_v48 = vpop.f32.mrf.mxu1 }
  0xfb   : > { %v705_v50 = vadd.f32 %v1885_v18, %v661_v48  ;;  %2067 = vmatmul.mubr.msk.f32.gmra.mxu1 %vm737_vm3, %v719_v43  ;;  %v723_v55 = vmax.f32 %v707_v49, 0.0 }
  0xfc   : > { %v2051_v52 = vpop.f32.mrf.mxu1  ;;  %2069 = vmatprep.mubr.msk.f32.mxu1 %vm737_vm3, %v720_v47 }
  0xfd   : > { %v721_v53 = vmax.f32 %v705_v50, 0.0  ;;  %v710_v57 = vadd.f32 %v2051_v52, %v1885_v18 }
  0xfe   : > { %v674_v54 = vpop.f32.mrf.mxu1 }
  0xff   : > { %v708_v56 = vadd.f32 %v1885_v18, %v674_v54  ;;  %2070 = vmatmul.mubr.msk.f32.gmra.mxu1 %vm737_vm3, %v721_v53  ;;  %v726_v63 = vmax.f32 %v710_v57, 0.0 }
 0x100   : > { %v2052_v58 = vpop.f32.mrf.mxu1  ;;  %2072 = vmatprep.mubr.msk.f32.mxu1 %vm737_vm3, %v722_v51 }
 0x101   : > { %v724_v59 = vmax.f32 %v708_v56, 0.0  ;;  %v711_v61 = vadd.f32 %v2052_v58, %v1885_v18 }
 0x102   : > { %v677_v60 = vpop.f32.mrf.mxu1 }
 0x103   : > { %v709_v62 = vadd.f32 %v1885_v18, %v677_v60  ;;  %2073 = vmatmul.mubr.msk.f32.gmra.mxu1 %vm737_vm3, %v723_v55  ;;  %v727_v1 = vmax.f32 %v711_v61, 0.0  ;;  %v359_v60 = vld [vmem:[%s2918_s1 + $0x30] sm:$0x33] }
 0x104   : > { %2075 = vmatprep.mubr.msk.f32.mxu1 %vm737_vm3, %v724_v59  ;;  %v1867_v61 = vcombine.high %v359_v60, %v359_v60 }
 0x105   : > { %v725_v0 = vmax.f32 %v709_v62, 0.0  ;;  %v1866_v62 = vcombine.low %v359_v60, %v359_v60 }
 0x107   : > { %2076 = vmatmul.mubr.msk.f32.gmra.mxu1 %vm737_vm3, %v725_v0  ;;  %v474_v0 = vand.u32 %v1867_v61, %v2394_v3 }
 0x108   : > { %2078 = vmatprep.mubr.msk.f32.mxu1 %vm737_vm3, %v726_v63  ;;  %v2288_v63 = vmov 0  }
 0x109   : > { %511 = vmatprep.mubr.bf16.mxu0 %v2288_v63  ;;  %489 = vmatprep.subr.bf16.mxu0 %v474_v0 }
 0x10b   : > { %2079 = vmatmul.mubr.msk.f32.gmra.mxu1 %vm737_vm3, %v727_v1  ;;  %v471_v1 = vand.u32 %v1866_v62, %v2394_v3  ;;  %v2142_v3 = vld [vmem:[%s2918_s1] ss:$12 sps:$4 sm:$0xff]  }
 0x10d   : > { %490 = vmatpush1.bf16.msra.mxu0 %v471_v1 }
 0x1af   : > { %v2059_v2 = vpop.f32.mrf.mxu1 }
 0x1b0   : > { %v2468_v11 = vadd.f32 %v2059_v2, %v1886_v4  ;;  %v2137_v2 = vld [vmem:[%s2918_s1 + $0x1c] ss:$12 sps:$4 sm:$0xff]  }
 0x1b1   : > { %v852_v5 = vpop.f32.mrf.mxu1  ;;  %491 = vmatprep.subr.bf16.mxu0 %v2137_v2 }
 0x1b2   : > { %v2466_v6 = vadd.f32 %v1886_v4, %v852_v5  ;;  %v935_v23 = vsel %vm931_vm4, %v2468_v11, -inf  ;;  %v2140_v5 = vld [vmem:[%s2918_s1 + $0x4] ss:$12 sps:$4 sm:$0xff]  }
 0x1b3   : > { %v2062_v8 = vpop.f32.mrf.mxu1 }
 0x1b4   : > { %v932_v17 = vsel %vm931_vm4, %v2466_v6, -inf  ;;  %v2474_v21 = vadd.f32 %v2062_v8, %v1886_v4  ;;  %v1116_v8 = vld [vmem:[%s2922_s5] sm:$0xff] }
 0x1b5   : > { %v862_v18 = vpop.f32.mrf.mxu1  ;;  %933 = vmax.xlane.f32.xlu0 %v932_v17  ;;  %v1904_v17 = vcombine.high %v1116_v8, %v1116_v8 }
 0x1b6   : > { %v2472_v19 = vadd.f32 %v1886_v4, %v862_v18  ;;  %v941_v28 = vsel %vm931_vm4, %v2474_v21, -inf  ;;  %v1903_v18 = vcombine.low %v1116_v8, %v1116_v8 }
 0x1b7   : > { %v2065_v20 = vpop.f32.mrf.mxu1 }
 0x1b8   : > { %v938_v22 = vsel %vm931_vm4, %v2472_v19, -inf  ;;  %v2480_v25 = vadd.f32 %v2065_v20, %v1886_v4  ;;  %v1148_v20 = vsel %vm1146_vm5, %v1903_v18, 0 }
 0x1b9   : > { %v872_v24 = vpop.f32.mrf.mxu1  ;;  %939 = vmax.xlane.f32.xlu1 %v938_v22  ;;  %936 = vmax.xlane.f32.xlu0 %v935_v23 }
 0x1ba   : > { %v2482_v26 = vadd.f32 %v1886_v4, %v872_v24  ;;  %v947_v32 = vsel %vm931_vm4, %v2480_v25, -inf }
 0x1bb   : > { %v2068_v27 = vpop.f32.mrf.mxu1 }
 0x1bc   : > { %v944_v29 = vsel %vm931_vm4, %v2482_v26, -inf  ;;  %v2492_v34 = vadd.f32 %v2068_v27, %v1886_v4 }
 0x1bd   : > { %v882_v30 = vpop.f32.mrf.mxu1  ;;  %942 = vmax.xlane.f32.xlu1 %v941_v28  ;;  %945 = vmax.xlane.f32.xlu0 %v944_v29 }
 0x1be   : > { %v2488_v31 = vadd.f32 %v1886_v4, %v882_v30  ;;  %v953_v40 = vsel %vm931_vm4, %v2492_v34, -inf }
 0x1bf   : > { %v2071_v33 = vpop.f32.mrf.mxu1 }
 0x1c0   : > { %v950_v35 = vsel %vm931_vm4, %v2488_v31, -inf  ;;  %v2496_v37 = vadd.f32 %v2071_v33, %v1886_v4 }
 0x1c1   : > { %v892_v36 = vpop.f32.mrf.mxu1  ;;  %948 = vmax.xlane.f32.xlu1 %v947_v32  ;;  %951 = vmax.xlane.f32.xlu0 %v950_v35 }
 0x1c2   : > { %v2498_v38 = vadd.f32 %v1886_v4, %v892_v36  ;;  %v959_v45 = vsel %vm931_vm4, %v2496_v37, -inf }
 0x1c3   : > { %v2074_v39 = vpop.f32.mrf.mxu1 }
 0x1c4   : > { %v956_v41 = vsel %vm931_vm4, %v2498_v38, -inf  ;;  %v2504_v43 = vadd.f32 %v2074_v39, %v1886_v4 }
 0x1c5   : > { %v902_v42 = vpop.f32.mrf.mxu1  ;;  %954 = vmax.xlane.f32.xlu1 %v953_v40  ;;  %957 = vmax.xlane.f32.xlu0 %v956_v41 }
 0x1c6   : > { %v2506_v44 = vadd.f32 %v1886_v4, %v902_v42  ;;  %v965_v51 = vsel %vm931_vm4, %v2504_v43, -inf }
 0x1c7   : > { %v2077_v46 = vpop.f32.mrf.mxu1 }
 0x1c8   : > { %v962_v47 = vsel %vm931_vm4, %v2506_v44, -inf  ;;  %v2512_v49 = vadd.f32 %v2077_v46, %v1886_v4 }
 0x1c9   : > { %960 = vmax.xlane.f32.xlu1 %v959_v45  ;;  %963 = vmax.xlane.f32.xlu0 %v962_v47  ;;  %v912_v48 = vpop.f32.mrf.mxu1 }
 0x1ca   : > { %v2514_v50 = vadd.f32 %v1886_v4, %v912_v48  ;;  %v971_v57 = vsel %vm931_vm4, %v2512_v49, -inf }
 0x1cb   : > { %v2080_v52 = vpop.f32.mrf.mxu1 }
 0x1cc   : > { %v968_v53 = vsel %vm931_vm4, %v2514_v50, -inf  ;;  %v2520_v55 = vadd.f32 %v2080_v52, %v1886_v4 }
 0x1cd   : > { %966 = vmax.xlane.f32.xlu1 %v965_v51  ;;  %v922_v54 = vpop.f32.mrf.mxu1  ;;  %969 = vmax.xlane.f32.xlu0 %v968_v53 }
 0x1ce   : > { %v2522_v56 = vadd.f32 %v1886_v4, %v922_v54  ;;  %v977_v59 = vsel %vm931_vm4, %v2520_v55, -inf  ;;  %v2139_v4 = vld [vmem:[%s2918_s1 + $0x18] ss:$12 sps:$4 sm:$0xff]  }
 0x1cf   : > { %492 = vmatpush1.bf16.msra.mxu0 %v2139_v4 }
 0x1d0   : > { %v974_v58 = vsel %vm931_vm4, %v2522_v56, -inf  ;;  %493 = vmatprep.subr.bf16.mxu0 %v2140_v5 }
 0x1d1   : > { %972 = vmax.xlane.f32.xlu1 %v971_v57  ;;  %975 = vmax.xlane.f32.xlu0 %v974_v58 }
 0x1d3   : > { %494 = vmatpush1.bf16.msra.mxu0 %v2142_v3 }
 0x1d4   : > { %1905 = vmatprep.subr.msk.bf16.mxu0 %vm1146_vm5, %v1904_v17 }
 0x1d5   : > { %978 = vmax.xlane.f32.xlu1 %v977_v59 }
 0x1d6   : > { %1869 = vmatmul.mubr.msk.bf16.vlgmr.msra.gmra.mxu0 %vm441_vm2, %v2406_v7 }
 0x1d7   : > { %1168 = vmatpush1.bf16.msra.mxu0 %v1148_v20  ;;  %521 = vmatprep.mubr.bf16.mxu0 %v2288_v63 }
 0x1de   : > { %1870 = vmatmul.mubr.msk.bf16.gmra.mxu0 %vm441_vm2, %v2413_v9 }
 0x1df   : > { %531 = vmatprep.mubr.bf16.mxu0 %v2288_v63 }
 0x1e6   : > { %1871 = vmatmul.mubr.msk.bf16.gmra.mxu0 %vm441_vm2, %v2415_v10 }
 0x1e7   : > { %541 = vmatprep.mubr.bf16.mxu0 %v2288_v63 }
 0x1ee   : > { %1872 = vmatmul.mubr.msk.bf16.gmra.mxu0 %vm441_vm2, %v2424_v12 }
 0x1ef   : > { %551 = vmatprep.mubr.bf16.mxu0 %v2288_v63 }
 0x1f6   : > { %1873 = vmatmul.mubr.msk.bf16.gmra.mxu0 %vm441_vm2, %v2426_v13 }
 0x1f7   : > { %561 = vmatprep.mubr.bf16.mxu0 %v2288_v63 }
 0x1fe   : > { %1874 = vmatmul.mubr.msk.bf16.gmra.mxu0 %vm441_vm2, %v2432_v14 }
 0x1ff   : > { %571 = vmatprep.mubr.bf16.mxu0 %v2288_v63 }
 0x206   : > { %1875 = vmatmul.mubr.msk.bf16.gmra.mxu0 %vm441_vm2, %v2434_v15 }
 0x207   : > { %581 = vmatprep.mubr.bf16.mxu0 %v2288_v63 }
 0x20e   : > { %1876 = vmatmul.mubr.msk.bf16.gmra.mxu0 %vm441_vm2, %v2440_v16 }
 0x20f   : > { %1185 = vmatprep.mubr.bf16.mxu0 %v2288_v63 }
 0x23e   : > { %v934_v7 = vpop.xlane.xlu0 %933 }
 0x23f   : > { %v980_v9 = vsub.f32 %v2466_v6, %v934_v7 }
 0x241   : > { %v996_v10 = vmul.f32 1.442695, %v980_v9 }
 0x242   : > { %v940_v12 = vpop.xlane.xlu1 %939  ;;  %v937_v13 = vpop.xlane.xlu0 %936 }
 0x243   : > { %2161 = vpow2.f32 %v996_v10  ;;  %v982_v14 = vsub.f32 %v2472_v19, %v940_v12  ;;  %v981_v22 = vsub.f32 %v2468_v11, %v937_v13 }
 0x245   : > { %v1000_v23 = vmul.f32 1.442695, %v982_v14  ;;  %v998_v15 = vmul.f32 1.442695, %v981_v22 }
 0x246   : > { %v943_v24 = vpop.xlane.xlu1 %942  ;;  %v946_v27 = vpop.xlane.xlu0 %945 }
 0x247   : > { %2163 = vpow2.f32 %v1000_v23  ;;  %v983_v16 = vsub.f32 %v2474_v21, %v943_v24  ;;  %v984_v28 = vsub.f32 %v2482_v26, %v946_v27 }
 0x248   : > { %2165 = vpow2.f32 %v998_v15 }
 0x249   : > { %v1002_v29 = vmul.f32 1.442695, %v983_v16  ;;  %v1004_v6 = vmul.f32 1.442695, %v984_v28 }
 0x24a   : > { %v949_v30 = vpop.xlane.xlu1 %948  ;;  %v952_v32 = vpop.xlane.xlu0 %951 }
 0x24b   : > { %2167 = vpow2.f32 %v1002_v29  ;;  %v985_v33 = vsub.f32 %v2480_v25, %v949_v30  ;;  %v986_v19 = vsub.f32 %v2488_v31, %v952_v32 }
 0x24c   : > { %2169 = vpow2.f32 %v1004_v6 }
 0x24d   : > { %v1006_v11 = vmul.f32 1.442695, %v985_v33  ;;  %v1008_v35 = vmul.f32 1.442695, %v986_v19  ;;  %v2145_v33 = vld [vmem:[%s2923_s6 + $0x78] sm:$0xff]  }
 0x24e   : > { %v955_v36 = vpop.xlane.xlu1 %954  ;;  %v958_v39 = vpop.xlane.xlu0 %957  ;;  %v2146_v19 = vld [vmem:[%s2923_s6 + $0x38] sm:$0xff]   ;;  %1967 = vmatprep.subr.bf16.mxu1 %v2145_v33 }
 0x24f   : > { %2171 = vpow2.f32 %v1006_v11  ;;  %v987_v21 = vsub.f32 %v2492_v34, %v955_v36  ;;  %v988_v26 = vsub.f32 %v2498_v38, %v958_v39  ;;  %v2147_v11 = vld [vmem:[%s2923_s6 + $0x70] sm:$0xff]   ;;  %1968 = vmatpush3.bf16.msra.mxu1 %v2146_v19  ;;  %v2149_v36 = vld [vmem:[%s2923_s6 + $0x68] sm:$0xff]  }
 0x250   : > { %v2584_v40 = vpop.eup %2161  ;;  %2173 = vpow2.f32 %v1008_v35  ;;  %v2148_v35 = vld [vmem:[%s2923_s6 + $0x30] sm:$0xff]   ;;  %1969 = vmatprep.subr.bf16.mxu1 %v2147_v11  ;;  %v2150_v39 = vld [vmem:[%s2923_s6 + $0x28] sm:$0xff]  }
 0x251   : > { %v1010_v41 = vmul.f32 1.442695, %v987_v21  ;;  %v1012_v42 = vmul.f32 1.442695, %v988_v26  ;;  %v1028_v25 = vsel %vm931_vm4, %v2584_v40, 0.0  ;;  %v2151_v21 = vld [vmem:[%s2923_s6 + $0x60] sm:$0xff]  }
 0x252   : > { %v961_v45 = vpop.xlane.xlu1 %960  ;;  %v964_v31 = vpop.xlane.xlu0 %963  ;;  %1029 = vadd.xlane.f32.xlu0 %v1028_v25  ;;  %v2152_v26 = vld [vmem:[%s2923_s6 + $0x20] sm:$0xff]   ;;  %v2155_v25 = vld [vmem:[%s2923_s6 + $0x50] sm:$0xff]  }
 0x253   : > { %2175 = vpow2.f32 %v1010_v41  ;;  %v989_v46 = vsub.f32 %v2496_v37, %v961_v45  ;;  %v990_v47 = vsub.f32 %v2506_v44, %v964_v31  ;;  %1970 = vmatpush3.bf16.msra.mxu1 %v2148_v35  ;;  %v2153_v41 = vld [vmem:[%s2923_s6 + $0x58] sm:$0xff]  }
 0x254   : > { %v2590_v48 = vpop.eup %2163  ;;  %2177 = vpow2.f32 %v1012_v42  ;;  %1971 = vmatprep.subr.bf16.mxu1 %v2149_v36  ;;  %v2154_v42 = vld [vmem:[%s2923_s6 + $0x18] sm:$0xff]  }
 0x255   : > { %v2592_v34 = vpop.eup %2165  ;;  %v1014_v38 = vmul.f32 1.442695, %v989_v46  ;;  %v1016_v51 = vmul.f32 1.442695, %v990_v47  ;;  %v1034_v52 = vsel %vm931_vm4, %v2590_v48, 0.0 }
 0x256   : > { %v967_v53 = vpop.xlane.xlu1 %966  ;;  %v1031_v54 = vsel %vm931_vm4, %v2592_v34, 0.0  ;;  %1035 = vadd.xlane.f32.xlu0 %v1034_v52  ;;  %v970_v57 = vpop.xlane.xlu0 %969 }
 0x257   : > { %2179 = vpow2.f32 %v1014_v38  ;;  %v991_v37 = vsub.f32 %v2504_v43, %v967_v53  ;;  %1032 = vadd.xlane.f32.xlu1 %v1031_v54  ;;  %v992_v44 = vsub.f32 %v2514_v50, %v970_v57  ;;  %1972 = vmatpush3.bf16.msra.mxu1 %v2150_v39 }
 0x258   : > { %v2600_v58 = vpop.eup %2167  ;;  %2181 = vpow2.f32 %v1016_v51  ;;  %1973 = vmatprep.subr.bf16.mxu1 %v2151_v21 }
 0x259   : > { %v2602_v59 = vpop.eup %2169  ;;  %v1018_v60 = vmul.f32 1.442695, %v991_v37  ;;  %v1020_v61 = vmul.f32 1.442695, %v992_v44  ;;  %v1037_v62 = vsel %vm931_vm4, %v2600_v58, 0.0 }
 0x25a   : > { %v973_v0 = vpop.xlane.xlu1 %972  ;;  %v1040_v1 = vsel %vm931_vm4, %v2602_v59, 0.0  ;;  %v976_v2 = vpop.xlane.xlu0 %975 }
 0x25b   : > { %2183 = vpow2.f32 %v1018_v60  ;;  %v993_v43 = vsub.f32 %v2512_v49, %v973_v0  ;;  %1038 = vadd.xlane.f32.xlu1 %v1037_v62  ;;  %1041 = vadd.xlane.f32.xlu0 %v1040_v1  ;;  %v994_v50 = vsub.f32 %v2522_v56, %v976_v2 }
 0x25c   : > { %v2610_v4 = vpop.eup %2171  ;;  %2185 = vpow2.f32 %v1020_v61  ;;  %1974 = vmatpush3.bf16.msra.mxu1 %v2152_v26 }
 0x25d   : > { %v2612_v5 = vpop.eup %2173  ;;  %v1022_v8 = vmul.f32 1.442695, %v993_v43  ;;  %v1024_v3 = vmul.f32 1.442695, %v994_v50  ;;  %v1043_v17 = vsel %vm931_vm4, %v2610_v4, 0.0  ;;  %1975 = vmatprep.subr.bf16.mxu1 %v2153_v41 }
 0x25e   : > { %v979_v18 = vpop.xlane.xlu1 %978  ;;  %v1046_v20 = vsel %vm931_vm4, %v2612_v5, 0.0 }
 0x25f   : > { %2187 = vpow2.f32 %v1022_v8  ;;  %1044 = vadd.xlane.f32.xlu1 %v1043_v17  ;;  %v995_v49 = vsub.f32 %v2520_v55, %v979_v18  ;;  %1047 = vadd.xlane.f32.xlu0 %v1046_v20 }
 0x260   : > { %v2619_v56 = vpop.eup %2175  ;;  %2189 = vpow2.f32 %v1024_v3  ;;  %1976 = vmatpush3.bf16.msra.mxu1 %v2154_v42  ;;  %v2160_v42 = vld [vmem:[%s2923_s6] sm:$0xff]  }
 0x261   : > { %v2621_v7 = vpop.eup %2177  ;;  %v1026_v9 = vmul.f32 1.442695, %v995_v49  ;;  %v1049_v10 = vsel %vm931_vm4, %v2619_v56, 0.0  ;;  %1977 = vmatprep.subr.bf16.mxu1 %v2155_v25 }
 0x262   : > { %v1052_v12 = vsel %vm931_vm4, %v2621_v7, 0.0 }
 0x263   : > { %2191 = vpow2.f32 %v1026_v9  ;;  %1050 = vadd.xlane.f32.xlu1 %v1049_v10  ;;  %1053 = vadd.xlane.f32.xlu0 %v1052_v12 }
 0x264   : > { %v2627_v13 = vpop.eup %2179 }
 0x265   : > { %v2629_v14 = vpop.eup %2181  ;;  %v1055_v55 = vsel %vm931_vm4, %v2627_v13, 0.0 }
 0x266   : > { %v1058_v22 = vsel %vm931_vm4, %v2629_v14, 0.0 }
 0x267   : > { %1056 = vadd.xlane.f32.xlu1 %v1055_v55  ;;  %1059 = vadd.xlane.f32.xlu0 %v1058_v22 }
 0x268   : > { %v2635_v23 = vpop.eup %2183 }
 0x269   : > { %v2637_v15 = vpop.eup %2185  ;;  %v1061_v24 = vsel %vm931_vm4, %v2635_v23, 0.0 }
 0x26a   : > { %v1064_v27 = vsel %vm931_vm4, %v2637_v15, 0.0 }
 0x26b   : > { %1062 = vadd.xlane.f32.xlu1 %v1061_v24  ;;  %1065 = vadd.xlane.f32.xlu0 %v1064_v27 }
 0x26c   : > { %v2643_v16 = vpop.eup %2187 }
 0x26d   : > { %v2645_v28 = vpop.eup %2189  ;;  %v1067_v29 = vsel %vm931_vm4, %v2643_v16, 0.0 }
 0x26e   : > { %v1070_v6 = vsel %vm931_vm4, %v2645_v28, 0.0 }
 0x26f   : > { %1068 = vadd.xlane.f32.xlu1 %v1067_v29  ;;  %1071 = vadd.xlane.f32.xlu0 %v1070_v6 }
 0x270   : > { %v2651_v30 = vpop.eup %2191 }
 0x271   : > { %v1073_v32 = vsel %vm931_vm4, %v2651_v30, 0.0 }
 0x273   : > { %1074 = vadd.xlane.f32.xlu1 %v1073_v32 }
 0x296   : > { %v513_v41 = vpop.f32.mrf.mxu0 }
 0x2db   : > { %v1030_v45 = vpop.xlane.xlu0 %1029 }
 0x2dc   : > { %2193 = vrcp.f32 %v1030_v45 }
 0x2df   : > { %v1036_v46 = vpop.xlane.xlu0 %1035 }
 0x2e0   : > { %v1033_v31 = vpop.xlane.xlu1 %1032 }
 0x2e1   : > { %2195 = vrcp.f32 %v1033_v31 }
 0x2e4   : > { %v1039_v47 = vpop.xlane.xlu1 %1038  ;;  %v1042_v52 = vpop.xlane.xlu0 %1041 }
 0x2e5   : > { %2197 = vrcp.f32 %v1039_v47 }
 0x2e6   : > { %2199 = vrcp.f32 %v1036_v46 }
 0x2e8   : > { %v1045_v38 = vpop.xlane.xlu1 %1044  ;;  %v1048_v62 = vpop.xlane.xlu0 %1047 }
 0x2e9   : > { %v2194_v51 = vpop.eup %2193  ;;  %2201 = vrcp.f32 %v1045_v38 }
 0x2ea   : > { %v1092_v54 = vmul.f32 %v2194_v51, %v2584_v40  ;;  %2203 = vrcp.f32 %v1042_v52 }
 0x2ec   : > { %v1051_v60 = vpop.xlane.xlu1 %1050  ;;  %v1054_v50 = vpop.xlane.xlu0 %1053 }
 0x2ed   : > { %2205 = vrcp.f32 %v1051_v60 }
 0x2ee   : > { %v2196_v53 = vpop.eup %2195  ;;  %2207 = vrcp.f32 %v1048_v62 }
 0x2ef   : > { %v1093_v57 = vmul.f32 %v2196_v53, %v2592_v34 }
 0x2f0   : > { %v1057_v43 = vpop.xlane.xlu1 %1056  ;;  %v1060_v20 = vpop.xlane.xlu0 %1059 }
 0x2f1   : > { %v1108_v37 = vpack.c.bf16 %v1093_v57, %v1092_v54  ;;  %2209 = vrcp.f32 %v1057_v43 }
 0x2f2   : > { %v2198_v44 = vpop.eup %2197  ;;  %2211 = vrcp.f32 %v1054_v50 }
 0x2f3   : > { %1906 = vmatmul.mubr.msk.bf16.vlgmr.msra.gmra.mxu0 %vm931_vm4, %v1108_v37  ;;  %v2200_v61 = vpop.eup %2199  ;;  %v1095_v0 = vmul.f32 %v2198_v44, %v2600_v58 }
 0x2f4   : > { %1195 = vmatprep.mubr.bf16.mxu0 %v2288_v63  ;;  %v1094_v1 = vmul.f32 %v2200_v61, %v2590_v48  ;;  %v1063_v18 = vpop.xlane.xlu1 %1062  ;;  %v1066_v55 = vpop.xlane.xlu0 %1065 }
 0x2f5   : > { %2213 = vrcp.f32 %v1063_v18 }
 0x2f6   : > { %v1109_v2 = vpack.c.bf16 %v1095_v0, %v1094_v1  ;;  %v2202_v40 = vpop.eup %2201  ;;  %2215 = vrcp.f32 %v1060_v20 }
 0x2f7   : > { %v2204_v34 = vpop.eup %2203  ;;  %v1097_v8 = vmul.f32 %v2202_v40, %v2610_v4 }
 0x2f8   : > { %v1096_v3 = vmul.f32 %v2204_v34, %v2602_v59  ;;  %v1069_v12 = vpop.xlane.xlu1 %1068  ;;  %v1072_v6 = vpop.xlane.xlu0 %1071 }
 0x2f9   : > { %2217 = vrcp.f32 %v1069_v12 }
 0x2fa   : > { %v1110_v17 = vpack.c.bf16 %v1097_v8, %v1096_v3  ;;  %v2206_v58 = vpop.eup %2205  ;;  %2219 = vrcp.f32 %v1066_v55 }
 0x2fb   : > { %1907 = vmatmul.mubr.msk.bf16.gmra.mxu0 %vm931_vm4, %v1109_v2  ;;  %v2208_v48 = vpop.eup %2207  ;;  %v1099_v49 = vmul.f32 %v2206_v58, %v2619_v56 }
 0x2fc   : > { %1205 = vmatprep.mubr.bf16.mxu0 %v2288_v63  ;;  %v1098_v9 = vmul.f32 %v2208_v48, %v2612_v5  ;;  %v1075_v29 = vpop.xlane.xlu1 %1074 }
 0x2fd   : > { %2221 = vrcp.f32 %v1075_v29 }
 0x2fe   : > { %v1111_v10 = vpack.c.bf16 %v1099_v49, %v1098_v9  ;;  %v2210_v4 = vpop.eup %2209  ;;  %2223 = vrcp.f32 %v1072_v6 }
 0x2ff   : > { %v2212_v59 = vpop.eup %2211  ;;  %v1101_v22 = vmul.f32 %v2210_v4, %v2627_v13 }
 0x300   : > { %v1100_v24 = vmul.f32 %v2212_v59, %v2621_v7 }
 0x302   : > { %v1112_v27 = vpack.c.bf16 %v1101_v22, %v1100_v24  ;;  %v2214_v56 = vpop.eup %2213 }
 0x303   : > { %1908 = vmatmul.mubr.msk.bf16.gmra.mxu0 %vm931_vm4, %v1110_v17  ;;  %v2216_v5 = vpop.eup %2215  ;;  %v1103_v32 = vmul.f32 %v2214_v56, %v2635_v23 }
 0x304   : > { %1215 = vmatprep.mubr.bf16.mxu0 %v2288_v63  ;;  %v1102_v33 = vmul.f32 %v2216_v5, %v2629_v14 }
 0x306   : > { %v1113_v19 = vpack.c.bf16 %v1103_v32, %v1102_v33  ;;  %v2218_v13 = vpop.eup %2217 }
 0x307   : > { %v2220_v7 = vpop.eup %2219  ;;  %v1105_v11 = vmul.f32 %v2218_v13, %v2643_v16  ;;  %v2156_v16 = vld [vmem:[%s2923_s6 + $0x10] sm:$0xff]  }
 0x308   : > { %v1104_v35 = vmul.f32 %v2220_v7, %v2637_v15  ;;  %1978 = vmatpush3.bf16.msra.mxu1 %v2156_v16  ;;  %v2157_v15 = vld [vmem:[%s2923_s6 + $0x48] sm:$0xff]  }
 0x309   : > { %1979 = vmatprep.subr.bf16.mxu1 %v2157_v15 }
 0x30a   : > { %v1114_v36 = vpack.c.bf16 %v1105_v11, %v1104_v35  ;;  %v2222_v39 = vpop.eup %2221 }
 0x30b   : > { %1909 = vmatmul.mubr.msk.bf16.gmra.mxu0 %vm931_vm4, %v1111_v10  ;;  %v2224_v21 = vpop.eup %2223  ;;  %v1107_v14 = vmul.f32 %v2222_v39, %v2651_v30  ;;  %v515_v30 = vpop.f32.mrf.mxu0 }
 0x30c   : > { %1225 = vmatprep.mubr.bf16.mxu0 %v2288_v63  ;;  %v1106_v23 = vmul.f32 %v2224_v21, %v2645_v28  ;;  %v2159_v28 = vld [vmem:[%s2923_s6 + $0x40] sm:$0xff]  }
 0x30d   : > { %v517_v25 = vpop.f32.mrf.mxu0 }
 0x30e   : > { %v1115_v26 = vpack.c.bf16 %v1107_v14, %v1106_v23 }
 0x30f   : > { %v519_v45 = vpop.f32.mrf.mxu0 }
 0x311   : > { %v523_v31 = vpop.f32.mrf.mxu0 }
 0x313   : > { %1910 = vmatmul.mubr.msk.bf16.gmra.mxu0 %vm931_vm4, %v1112_v27  ;;  %v525_v46 = vpop.f32.mrf.mxu0 }
 0x314   : > { %1235 = vmatprep.mubr.bf16.mxu0 %v2288_v63 }
 0x315   : > { %v527_v47 = vpop.f32.mrf.mxu0 }
 0x317   : > { %v529_v38 = vpop.f32.mrf.mxu0 }
 0x319   : > { %v533_v51 = vpop.f32.mrf.mxu0 }
 0x31b   : > { %1911 = vmatmul.mubr.msk.bf16.gmra.mxu0 %vm931_vm4, %v1113_v19  ;;  %v535_v52 = vpop.f32.mrf.mxu0 }
 0x31c   : > { %1245 = vmatprep.mubr.bf16.mxu0 %v2288_v63 }
 0x31d   : > { %v537_v53 = vpop.f32.mrf.mxu0 }
 0x31f   : > { %v539_v54 = vpop.f32.mrf.mxu0 }
 0x321   : > { %v2734_v57 = vpop.f32.mrf.mxu0 }
 0x323   : > { %1912 = vmatmul.mubr.msk.bf16.gmra.mxu0 %vm931_vm4, %v1114_v36  ;;  %v545_v37 = vpop.f32.mrf.mxu0 }
 0x324   : > { %1255 = vmatprep.mubr.bf16.mxu0 %v2288_v63  ;;  %v2158_v63 = vld [vmem:[%s2923_s6 + $0x8] sm:$0xff]  }
 0x325   : > { %1980 = vmatpush3.bf16.msra.mxu1 %v2158_v63  ;;  %v547_v44 = vpop.f32.mrf.mxu0 }
 0x326   : > { %1981 = vmatprep.subr.bf16.mxu1 %v2159_v28 }
 0x327   : > { %v549_v60 = vpop.f32.mrf.mxu0 }
 0x329   : > { %1982 = vmatpush3.bf16.msra.mxu1 %v2160_v42  ;;  %v2736_v61 = vpop.f32.mrf.mxu0 }
 0x32b   : > { %1913 = vmatmul.mubr.msk.bf16.gmra.mxu0 %vm931_vm4, %v1115_v26  ;;  %v2738_v62 = vpop.f32.mrf.mxu0 }
 0x32d   : > { %v2740_v0 = vpop.f32.mrf.mxu0 }
 0x32f   : > { %v2742_v1 = vpop.f32.mrf.mxu0 }
 0x331   : > { %v2744_v2 = vpop.f32.mrf.mxu0 }
 0x333   : > { %v2746_v40 = vpop.f32.mrf.mxu0 }
 0x335   : > { %v2748_v43 = vpop.f32.mrf.mxu0 }
 0x337   : > { %v2750_v34 = vpop.f32.mrf.mxu0 }
 0x339   : > { %v2752_v50 = vpop.f32.mrf.mxu0 }
 0x33b   : > { %v2754_v8 = vpop.f32.mrf.mxu0 }
 0x33d   : > { %v2756_v3 = vpop.f32.mrf.mxu0 }
 0x33f   : > { %v2758_v17 = vpop.f32.mrf.mxu0 }
 0x341   : > { %v2760_v58 = vpop.f32.mrf.mxu0 }
 0x343   : > { %v2762_v18 = vpop.f32.mrf.mxu0 }
 0x345   : > { %v2764_v48 = vpop.f32.mrf.mxu0 }
 0x347   : > { %v2766_v20 = vpop.f32.mrf.mxu0 }
 0x3b3   : > { %v1187_v49 = vpop.f32.mrf.mxu0 }
 0x3b4   : > { %v1266_v22 = vmul.f32 %v1187_v49, %v513_v41 }
 0x3b5   : > { %v1189_v9 = vpop.f32.mrf.mxu0 }
 0x3b6   : > { %v1267_v59 = vmul.f32 %v1189_v9, %v515_v30 }
 0x3b7   : > { %v1191_v10 = vpop.f32.mrf.mxu0 }
 0x3b8   : > { %v1268_v4 = vmul.f32 %v1191_v10, %v517_v25 }
 0x3b9   : > { %v1193_v12 = vpop.f32.mrf.mxu0 }
 0x3ba   : > { %v1269_v55 = vmul.f32 %v1193_v12, %v519_v45  ;;  %v1298_v56 = vpack.c.bf16 %v1268_v4, %v1266_v22 }
 0x3bb   : > { %v1197_v24 = vpop.f32.mrf.mxu0 }
 0x3bc   : > { %v1299_v27 = vpack.c.bf16 %v1269_v55, %v1267_v59  ;;  %v1270_v13 = vmul.f32 %v1197_v24, %v523_v31 }
 0x3bd   : > { %v1199_v29 = vpop.f32.mrf.mxu0 }
 0x3be   : > { %1474 = vmatprep.mubr.bf16.mxu1 %v1299_v27  ;;  %v1271_v33 = vmul.f32 %v1199_v29, %v525_v46 }
 0x3bf   : > { %v1201_v5 = vpop.f32.mrf.mxu0  ;;  %1475 = vmatmul.mubr.bf16.vlgmr.msra.gmra.mxu1 %v1298_v56 }
 0x3c0   : > { %v1272_v6 = vmul.f32 %v1201_v5, %v527_v47 }
 0x3c1   : > { %v1203_v32 = vpop.f32.mrf.mxu0 }
 0x3c2   : > { %v1273_v19 = vmul.f32 %v1203_v32, %v529_v38  ;;  %v1300_v35 = vpack.c.bf16 %v1272_v6, %v1270_v13 }
 0x3c3   : > { %v1207_v7 = vpop.f32.mrf.mxu0 }
 0x3c4   : > { %v1301_v11 = vpack.c.bf16 %v1273_v19, %v1271_v33  ;;  %v1274_v16 = vmul.f32 %v1207_v7, %v533_v51 }
 0x3c5   : > { %v1209_v36 = vpop.f32.mrf.mxu0 }
 0x3c6   : > { %1482 = vmatprep.mubr.bf16.mxu1 %v1301_v11  ;;  %v1275_v23 = vmul.f32 %v1209_v36, %v535_v52 }
 0x3c7   : > { %v1211_v39 = vpop.f32.mrf.mxu0  ;;  %1483 = vmatmul.mubr.bf16.gmra.mxu1 %v1300_v35 }
 0x3c8   : > { %v1276_v21 = vmul.f32 %v1211_v39, %v537_v53 }
 0x3c9   : > { %v1213_v14 = vpop.f32.mrf.mxu0 }
 0x3ca   : > { %v1277_v26 = vmul.f32 %v1213_v14, %v539_v54  ;;  %v1302_v63 = vpack.c.bf16 %v1276_v21, %v1274_v16 }
 0x3cb   : > { %v1217_v41 = vpop.f32.mrf.mxu0 }
 0x3cc   : > { %v1303_v15 = vpack.c.bf16 %v1277_v26, %v1275_v23  ;;  %v1278_v46 = vmul.f32 %v1217_v41, %v2734_v57 }
 0x3cd   : > { %v1219_v30 = vpop.f32.mrf.mxu0 }
 0x3ce   : > { %1490 = vmatprep.mubr.bf16.mxu1 %v1303_v15  ;;  %v1279_v45 = vmul.f32 %v1219_v30, %v545_v37 }
 0x3cf   : > { %v1221_v28 = vpop.f32.mrf.mxu0  ;;  %1491 = vmatmul.mubr.bf16.gmra.mxu1 %v1302_v63 }
 0x3d0   : > { %v1280_v42 = vmul.f32 %v1221_v28, %v547_v44 }
 0x3d1   : > { %v1223_v25 = vpop.f32.mrf.mxu0 }
 0x3d2   : > { %v1281_v31 = vmul.f32 %v1223_v25, %v549_v60  ;;  %v1304_v53 = vpack.c.bf16 %v1280_v42, %v1278_v46 }
 0x3d3   : > { %v1227_v47 = vpop.f32.mrf.mxu0 }
 0x3d4   : > { %v1305_v38 = vpack.c.bf16 %v1281_v31, %v1279_v45  ;;  %v1282_v44 = vmul.f32 %v1227_v47, %v2736_v61 }
 0x3d5   : > { %v1229_v49 = vpop.f32.mrf.mxu0 }
 0x3d6   : > { %1498 = vmatprep.mubr.bf16.mxu1 %v1305_v38  ;;  %v1283_v9 = vmul.f32 %v1229_v49, %v2738_v62 }
 0x3d7   : > { %v1231_v52 = vpop.f32.mrf.mxu0  ;;  %1499 = vmatmul.mubr.bf16.gmra.mxu1 %v1304_v53 }
 0x3d8   : > { %v1284_v51 = vmul.f32 %v1231_v52, %v2740_v0 }
 0x3d9   : > { %v1233_v54 = vpop.f32.mrf.mxu0 }
 0x3da   : > { %v1285_v10 = vmul.f32 %v1233_v54, %v2742_v1  ;;  %v1306_v4 = vpack.c.bf16 %v1284_v51, %v1282_v44 }
 0x3db   : > { %v1237_v37 = vpop.f32.mrf.mxu0 }
 0x3dc   : > { %v1307_v60 = vpack.c.bf16 %v1285_v10, %v1283_v9  ;;  %v1286_v62 = vmul.f32 %v1237_v37, %v2744_v2 }
 0x3dd   : > { %v1239_v57 = vpop.f32.mrf.mxu0 }
 0x3de   : > { %1506 = vmatprep.mubr.bf16.mxu1 %v1307_v60  ;;  %v1287_v22 = vmul.f32 %v1239_v57, %v2746_v40 }
 0x3df   : > { %v1241_v12 = vpop.f32.mrf.mxu0  ;;  %1507 = vmatmul.mubr.bf16.gmra.mxu1 %v1306_v4 }
 0x3e0   : > { %v1288_v59 = vmul.f32 %v1241_v12, %v2748_v43 }
 0x3e1   : > { %v1243_v55 = vpop.f32.mrf.mxu0 }
 0x3e2   : > { %v1289_v0 = vmul.f32 %v1243_v55, %v2750_v34  ;;  %v1308_v27 = vpack.c.bf16 %v1288_v59, %v1286_v62 }
 0x3e3   : > { %v1247_v24 = vpop.f32.mrf.mxu0 }
 0x3e4   : > { %v1309_v1 = vpack.c.bf16 %v1289_v0, %v1287_v22  ;;  %v1290_v40 = vmul.f32 %v1247_v24, %v2752_v50 }
 0x3e5   : > { %v1249_v61 = vpop.f32.mrf.mxu0 }
 0x3e6   : > { %1514 = vmatprep.mubr.bf16.mxu1 %v1309_v1  ;;  %v1291_v6 = vmul.f32 %v1249_v61, %v2754_v8 }
 0x3e7   : > { %v1251_v56 = vpop.f32.mrf.mxu0  ;;  %1515 = vmatmul.mubr.bf16.gmra.mxu1 %v1308_v27 }
 0x3e8   : > { %v1292_v29 = vmul.f32 %v1251_v56, %v2756_v3 }
 0x3e9   : > { %v1253_v5 = vpop.f32.mrf.mxu0 }
 0x3ea   : > { %v1293_v43 = vmul.f32 %v1253_v5, %v2758_v17  ;;  %v1310_v33 = vpack.c.bf16 %v1292_v29, %v1290_v40 }
 0x3eb   : > { %v1257_v32 = vpop.f32.mrf.mxu0 }
 0x3ec   : > { %v1311_v34 = vpack.c.bf16 %v1293_v43, %v1291_v6  ;;  %v1294_v8 = vmul.f32 %v1257_v32, %v2760_v58 }
 0x3ed   : > { %v1259_v2 = vpop.f32.mrf.mxu0 }
 0x3ee   : > { %1522 = vmatprep.mubr.bf16.mxu1 %v1311_v34  ;;  %v1295_v11 = vmul.f32 %v1259_v2, %v2762_v18 }
 0x3ef   : > { %v1261_v19 = vpop.f32.mrf.mxu0  ;;  %1523 = vmatmul.mubr.bf16.gmra.mxu1 %v1310_v33 }
 0x3f0   : > { %v1296_v13 = vmul.f32 %v1261_v19, %v2764_v48 }
 0x3f1   : > { %v1263_v7 = vpop.f32.mrf.mxu0 }
 0x3f2   : > { %v1297_v3 = vmul.f32 %v1263_v7, %v2766_v20  ;;  %v1312_v17 = vpack.c.bf16 %v1296_v13, %v1294_v8 }
 0x3f4   : > { %v1313_v35 = vpack.c.bf16 %v1297_v3, %v1295_v11  ;;  %v2795_v11 = vld [vmem:[%s2924_s7] ss:$0 sm:$0xff] }
 0x3f6   : > { %1530 = vmatprep.mubr.bf16.mxu1 %v1313_v35 }
 0x3f7   : > { %1531 = vmatmul.mubr.bf16.gmra.mxu1 %v1312_v17 }
 0x47f   : > { %v1983_v50 = vpop.f32.mrf.mxu1 }
 0x481   : > { %v1984_v36 = vpop.f32.mrf.mxu1 }
 0x482   : > { %v1985_v14 = vadd.f32 %v1984_v36, %v1983_v50 }
 0x483   : > { %v1986_v39 = vpop.f32.mrf.mxu1 }
 0x484   : > { %v1540_v20 = vsel %vm1539_vm6, %v1985_v14, -inf }
 0x485   : > { %v1987_v21 = vpop.f32.mrf.mxu1  ;;  %v1541_v30 = vrot.slane %v1540_v20, 4 }
 0x486   : > { %v1988_v23 = vadd.f32 %v1987_v21, %v1986_v39 }
 0x487   : > { %v1989_v26 = vpop.f32.mrf.mxu1  ;;  %v1542_v38 = vmax.f32 %v1540_v20, %v1541_v30 }
 0x488   : > { %v1547_v48 = vsel %vm1539_vm6, %v1988_v23, -inf }
 0x489   : > { %v1548_v16 = vrot.slane %v1547_v48, 4  ;;  %v1990_v18 = vpop.f32.mrf.mxu1  ;;  %v1543_v60 = vrot.slane %v1542_v38, 2 }
 0x48a   : > { %v1991_v41 = vadd.f32 %v1990_v18, %v1989_v26 }
 0x48b   : > { %v1549_v58 = vmax.f32 %v1547_v48, %v1548_v16  ;;  %v1992_v15 = vpop.f32.mrf.mxu1  ;;  %v1544_v27 = vmax.f32 %v1542_v38, %v1543_v60 }
 0x48c   : > { %v1554_v63 = vsel %vm1539_vm6, %v1991_v41, -inf  ;;  %v2803_v41 = vld [vmem:[%s2925_s8] ss:$0 sm:$0xff] }
 0x48d   : > { %v1555_v28 = vrot.slane %v1554_v63, 4  ;;  %v1993_v42 = vpop.f32.mrf.mxu1  ;;  %v1550_v45 = vrot.slane %v1549_v58, 2  ;;  %v1545_v19 = vrot.slane %v1544_v27, 1 }
 0x48e   : > { %v1994_v25 = vadd.f32 %v1993_v42, %v1992_v15 }
 0x48f   : > { %v1556_v31 = vmax.f32 %v1554_v63, %v1555_v28  ;;  %v1995_v46 = vpop.f32.mrf.mxu1  ;;  %v1551_v54 = vmax.f32 %v1549_v58, %v1550_v45  ;;  %v1546_v48 = vmax.f32 %v1544_v27, %v1545_v19 }
 0x490   : > { %v1561_v47 = vsel %vm1539_vm6, %v1994_v25, -inf }
 0x491   : > { %v1557_v53 = vrot.slane %v1556_v31, 2  ;;  %v1562_v49 = vrot.slane %v1561_v47, 4  ;;  %v1996_v52 = vpop.f32.mrf.mxu1  ;;  %v1552_v55 = vrot.slane %v1551_v54, 1 }
 0x492   : > { %v1997_v51 = vadd.f32 %v1996_v52, %v1995_v46  ;;  %v1659_v46 = vmul.f32 %v2795_v11, %v1546_v48 }
 0x493   : > { %v1563_v9 = vmax.f32 %v1561_v47, %v1562_v49  ;;  %v1998_v10 = vpop.f32.mrf.mxu1  ;;  %v1558_v44 = vmax.f32 %v1556_v31, %v1557_v53  ;;  %v1553_v43 = vmax.f32 %v1551_v54, %v1552_v55 }
 0x494   : > { %v1568_v37 = vsel %vm1539_vm6, %v1997_v51, -inf }
 0x495   : > { %v1564_v4 = vrot.slane %v1563_v9, 2  ;;  %v1999_v57 = vpop.f32.mrf.mxu1  ;;  %v1569_v12 = vrot.slane %v1568_v37, 4  ;;  %v1559_v62 = vrot.slane %v1558_v44, 1  ;;  %v1660_v50 = vmul.f32 %v2795_v11, %v1553_v43 }
 0x496   : > { %v2000_v59 = vadd.f32 %v1999_v57, %v1998_v10 }
 0x497   : > { %v1565_v22 = vmax.f32 %v1563_v9, %v1564_v4  ;;  %v2001_v0 = vpop.f32.mrf.mxu1  ;;  %v1570_v24 = vmax.f32 %v1568_v37, %v1569_v12  ;;  %v1560_v34 = vmax.f32 %v1558_v44, %v1559_v62  ;;  %v1683_v63 = vadd.f32 %v2803_v41, %v1660_v50 }
 0x498   : > { %v1575_v1 = vsel %vm1539_vm6, %v2000_v59, -inf  ;;  %v1682_v59 = vadd.f32 %v2803_v41, %v1659_v46 }
 0x499   : > { %v1576_v61 = vrot.slane %v1575_v1, 4  ;;  %v2002_v56 = vpop.f32.mrf.mxu1  ;;  %v1566_v29 = vrot.slane %v1565_v22, 1  ;;  %v1571_v5 = vrot.slane %v1570_v24, 2  ;;  %v1661_v21 = vmul.f32 %v2795_v11, %v1560_v34 }
 0x49a   : > { %v2003_v6 = vadd.f32 %v2002_v56, %v2001_v0  ;;  %v1699_v9 = vmax.f32 %v1683_v63, 0.0 }
 0x49b   : > { %v1577_v40 = vmax.f32 %v1575_v1, %v1576_v61  ;;  %v2004_v32 = vpop.f32.mrf.mxu1  ;;  %v1572_v33 = vmax.f32 %v1570_v24, %v1571_v5  ;;  %v1567_v3 = vmax.f32 %v1565_v22, %v1566_v29  ;;  %v1684_v45 = vadd.f32 %v2803_v41, %v1661_v21 }
 0x49c   : > { %v1582_v2 = vsel %vm1539_vm6, %v2003_v6, -inf  ;;  %v1730_v61 = vrot.slane %v1699_v9, 7 }
 0x49d   : > { %v1578_v13 = vrot.slane %v1577_v40, 2  ;;  %v2005_v7 = vpop.f32.mrf.mxu1  ;;  %v1573_v8 = vrot.slane %v1572_v33, 1  ;;  %v1583_v35 = vrot.slane %v1582_v2, 4  ;;  %v1662_v58 = vmul.f32 %v2795_v11, %v1567_v3 }
 0x49e   : > { %v2006_v17 = vadd.f32 %v2005_v7, %v2004_v32  ;;  %v1700_v60 = vmax.f32 %v1684_v45, 0.0 }
 0x49f   : > { %v1579_v36 = vmax.f32 %v1577_v40, %v1578_v13  ;;  %v2007_v39 = vpop.f32.mrf.mxu1  ;;  %v1574_v14 = vmax.f32 %v1572_v33, %v1573_v8  ;;  %v1584_v23 = vmax.f32 %v1582_v2, %v1583_v35  ;;  %v1685_v49 = vadd.f32 %v2803_v41, %v1662_v58 }
 0x4a0   : > { %v1589_v26 = vsel %vm1539_vm6, %v2006_v17, -inf  ;;  %v1733_v43 = vrot.slane %v1700_v60, 6  ;;  %v1698_v33 = vmax.f32 %v1682_v59, 0.0 }
 0x4a1   : > { %v1580_v16 = vrot.slane %v1579_v36, 1  ;;  %v1590_v18 = vrot.slane %v1589_v26, 4  ;;  %v2008_v20 = vpop.f32.mrf.mxu1  ;;  %v1585_v15 = vrot.slane %v1584_v23, 2  ;;  %v1663_v30 = vmul.f32 %v2795_v11, %v1574_v14 }
 0x4a2   : > { %v2009_v51 = vadd.f32 %v2008_v20, %v2007_v39  ;;  %v1701_v62 = vmax.f32 %v1685_v49, 0.0  ;;  %v1732_v17 = vsel %vm1731_vm7, %v1730_v61, %v1698_v33 }
 0x4a3   : > { %v1581_v28 = vmax.f32 %v1579_v36, %v1580_v16  ;;  %v1591_v42 = vmax.f32 %v1589_v26, %v1590_v18  ;;  %v2010_v25 = vpop.f32.mrf.mxu1  ;;  %v1586_v31 = vmax.f32 %v1584_v23, %v1585_v15  ;;  %v1686_v10 = vadd.f32 %v2803_v41, %v1663_v30 }
 0x4a4   : > { %v1596_v1 = vsel %vm1539_vm6, %v2009_v51, -inf  ;;  %v1736_v7 = vrot.slane %v1701_v62, 5  ;;  %v1735_v14 = vsel %vm1734_vm8, %v1733_v43, %v1732_v17 }
 0x4a5   : > { %v1664_v47 = vmul.f32 %v2795_v11, %v1581_v28  ;;  %v1592_v38 = vrot.slane %v1591_v42, 2  ;;  %v2011_v53 = vpop.f32.mrf.mxu1  ;;  %v1587_v52 = vrot.slane %v1586_v31, 1  ;;  %v1702_v56 = vmax.f32 %v1686_v10, 0.0 }
 0x4a6   : > { %v2012_v54 = vadd.f32 %v2011_v53, %v2010_v25  ;;  %v1597_v19 = vrot.slane %v1596_v1, 4  ;;  %v1738_v63 = vsel %vm1737_vm9, %v1736_v7, %v1735_v14 }
 0x4a7   : > { %v1593_v44 = vmax.f32 %v1591_v42, %v1592_v38  ;;  %v2013_v37 = vpop.f32.mrf.mxu1  ;;  %v1687_v4 = vadd.f32 %v2803_v41, %v1664_v47  ;;  %v1588_v57 = vmax.f32 %v1586_v31, %v1587_v52  ;;  %v1739_v50 = vrot.slane %v1702_v56, 4 }
 0x4a8   : > { %v1603_v12 = vsel %vm1539_vm6, %v2012_v54, -inf  ;;  %v1598_v20 = vmax.f32 %v1596_v1, %v1597_v19 }
 0x4a9   : > { %v1594_v55 = vrot.slane %v1593_v44, 1  ;;  %v1604_v22 = vrot.slane %v1603_v12, 4  ;;  %v2014_v0 = vpop.f32.mrf.mxu1  ;;  %v1665_v24 = vmul.f32 %v2795_v11, %v1588_v57  ;;  %v1703_v40 = vmax.f32 %v1687_v4, 0.0 }
 0x4aa   : > { %v2015_v27 = vadd.f32 %v2014_v0, %v2013_v37  ;;  %v1741_v42 = vsel %vm1740_vm10, %v1739_v50, %v1738_v63  ;;  %v1599_v49 = vrot.slane %v1598_v20, 2 }
 0x4ab   : > { %v1595_v29 = vmax.f32 %v1593_v44, %v1594_v55  ;;  %v1605_v5 = vmax.f32 %v1603_v12, %v1604_v22  ;;  %v2016_v6 = vpop.f32.mrf.mxu1  ;;  %v1688_v32 = vadd.f32 %v2803_v41, %v1665_v24  ;;  %v1742_v23 = vrot.slane %v1703_v40, 3 }
 0x4ac   : > { %v1610_v34 = vsel %vm1539_vm6, %v2015_v27, -inf  ;;  %v1600_v55 = vmax.f32 %v1598_v20, %v1599_v49 }
 0x4ad   : > { %v1666_v2 = vmul.f32 %v2795_v11, %v1595_v29  ;;  %v2017_v13 = vpop.f32.mrf.mxu1  ;;  %v1704_v3 = vmax.f32 %v1688_v32, 0.0  ;;  %v1611_v8 = vrot.slane %v1610_v34, 4  ;;  %v1606_v39 = vrot.slane %v1605_v5, 2 }
 0x4ae   : > { %v2018_v35 = vadd.f32 %v2017_v13, %v2016_v6  ;;  %v1744_v47 = vsel %vm1743_vm11, %v1742_v23, %v1741_v42  ;;  %v1601_v43 = vrot.slane %v1600_v55, 1 }
 0x4af   : > { %v1689_v36 = vadd.f32 %v2803_v41, %v1666_v2  ;;  %v2019_v21 = vpop.f32.mrf.mxu1  ;;  %v1612_v26 = vmax.f32 %v1610_v34, %v1611_v8  ;;  %v1745_v16 = vrot.slane %v1704_v3, 2  ;;  %v1607_v45 = vmax.f32 %v1605_v5, %v1606_v39 }
 0x4b0   : > { %v1617_v48 = vsel %vm1539_vm6, %v2018_v35, -inf  ;;  %v1602_v50 = vmax.f32 %v1600_v55, %v1601_v43 }
 0x4b1   : > { %v1705_v18 = vmax.f32 %v1689_v36, 0.0  ;;  %v1618_v58 = vrot.slane %v1617_v48, 4  ;;  %v2020_v15 = vpop.f32.mrf.mxu1  ;;  %v1613_v30 = vrot.slane %v1612_v26, 2  ;;  %v1747_v9 = vsel %vm1746_vm12, %v1745_v16, %v1744_v47 }
 0x4b2   : > { %v2021_v28 = vadd.f32 %v2020_v15, %v2019_v21  ;;  %v1608_v37 = vrot.slane %v1607_v45, 1 }
 0x4b3   : > { %v1748_v25 = vrot.slane %v1705_v18, 1  ;;  %v1619_v31 = vmax.f32 %v1617_v48, %v1618_v58  ;;  %v2022_v46 = vpop.f32.mrf.mxu1  ;;  %v1614_v38 = vmax.f32 %v1612_v26, %v1613_v30  ;;  %v1667_v58 = vmul.f32 %v2795_v11, %v1602_v50 }
 0x4b4   : > { %v1624_v53 = vsel %vm1539_vm6, %v2021_v28, -inf  ;;  %v1609_v27 = vmax.f32 %v1607_v45, %v1608_v37 }
 0x4b5   : > { %v1620_v52 = vrot.slane %v1619_v31, 2  ;;  %v1625_v51 = vrot.slane %v1624_v53, 4  ;;  %v2023_v54 = vpop.f32.mrf.mxu1  ;;  %v1750_v44 = vsel %vm1749_vm13, %v1748_v25, %v1747_v9  ;;  %v1615_v12 = vrot.slane %v1614_v38, 1 }
 0x4b6   : > { %v2024_v10 = vadd.f32 %v2023_v54, %v2022_v46  ;;  %1767 = vst.msk [vmem:[%s2834_s14] sm:$0xff] %vm1539_vm6, %v1750_v44  ;;  %v1668_v13 = vmul.f32 %v2795_v11, %v1609_v27 }
 0x4b7   : > { %v1621_v60 = vmax.f32 %v1619_v31, %v1620_v52  ;;  %v1626_v4 = vmax.f32 %v1624_v53, %v1625_v51  ;;  %v2025_v57 = vpop.f32.mrf.mxu1  ;;  %v1616_v5 = vmax.f32 %v1614_v38, %v1615_v12  ;;  %v1690_v38 = vadd.f32 %v2803_v41, %v1667_v58 }
 0x4b8   : > { %v1631_v59 = vsel %vm1539_vm6, %v2024_v10, -inf  ;;  %v1691_v26 = vadd.f32 %v2803_v41, %v1668_v13 }
 0x4b9   : > { %v1622_v22 = vrot.slane %v1621_v60, 1  ;;  %v1627_v0 = vrot.slane %v1626_v4, 2  ;;  %v1632_v62 = vrot.slane %v1631_v59, 4  ;;  %v2026_v24 = vpop.f32.mrf.mxu1  ;;  %v1669_v8 = vmul.f32 %v2795_v11, %v1616_v5 }
 0x4ba   : > { %v2027_v1 = vadd.f32 %v2026_v24, %v2025_v57  ;;  %v1707_v25 = vmax.f32 %v1691_v26, 0.0 }
 0x4bb   : > { %v1628_v61 = vmax.f32 %v1626_v4, %v1627_v0  ;;  %v1633_v56 = vmax.f32 %v1631_v59, %v1632_v62  ;;  %v2028_v29 = vpop.f32.mrf.mxu1  ;;  %v1623_v40 = vmax.f32 %v1621_v60, %v1622_v22  ;;  %v1692_v18 = vadd.f32 %v2803_v41, %v1669_v8 }
 0x4bc   : > { %v1638_v6 = vsel %vm1539_vm6, %v2027_v1, -inf  ;;  %v1751_v54 = vrot.slane %v1707_v25, 7  ;;  %v1706_v60 = vmax.f32 %v1690_v38, 0.0 }
 0x4bd   : > { %v1629_v32 = vrot.slane %v1628_v61, 1  ;;  %v1634_v34 = vrot.slane %v1633_v56, 2  ;;  %v2029_v33 = vpop.f32.mrf.mxu1  ;;  %v1639_v2 = vrot.slane %v1638_v6, 4  ;;  %v1670_v36 = vmul.f32 %v2795_v11, %v1623_v40 }
 0x4be   : > { %v2030_v19 = vadd.f32 %v2029_v33, %v2028_v29  ;;  %v1708_v46 = vmax.f32 %v1692_v18, 0.0  ;;  %v1752_v55 = vsel %vm1731_vm7, %v1751_v54, %v1706_v60 }
 0x4bf   : > { %v1630_v7 = vmax.f32 %v1628_v61, %v1629_v32  ;;  %v1635_v3 = vmax.f32 %v1633_v56, %v1634_v34  ;;  %v1640_v35 = vmax.f32 %v1638_v6, %v1639_v2  ;;  %v1693_v15 = vadd.f32 %v2803_v41, %v1670_v36 }
 0x4c0   : > { %v1645_v17 = vsel %vm1539_vm6, %v2030_v19, -inf  ;;  %v1753_v44 = vrot.slane %v1708_v46, 6 }
 0x4c1   : > { %v1636_v39 = vrot.slane %v1635_v3, 1  ;;  %v1646_v21 = vrot.slane %v1645_v17, 4  ;;  %v1671_v14 = vmul.f32 %v2795_v11, %v1630_v7  ;;  %v1641_v23 = vrot.slane %v1640_v35, 2 }
 0x4c2   : > { %v1709_v53 = vmax.f32 %v1693_v15, 0.0  ;;  %v1754_v62 = vsel %vm1734_vm8, %v1753_v44, %v1752_v55 }
 0x4c3   : > { %v1637_v48 = vmax.f32 %v1635_v3, %v1636_v39  ;;  %v1647_v16 = vmax.f32 %v1645_v17, %v1646_v21  ;;  %v1642_v20 = vmax.f32 %v1640_v35, %v1641_v23  ;;  %v1694_v28 = vadd.f32 %v2803_v41, %v1671_v14 }
 0x4c4   : > { %v1755_v4 = vrot.slane %v1709_v53, 5 }
 0x4c5   : > { %v1672_v63 = vmul.f32 %v2795_v11, %v1637_v48  ;;  %v1648_v30 = vrot.slane %v1647_v16, 2  ;;  %v1643_v42 = vrot.slane %v1642_v20, 1  ;;  %v1710_v52 = vmax.f32 %v1694_v28, 0.0 }
 0x4c6   : > { %v1756_v1 = vsel %vm1737_vm9, %v1755_v4, %v1754_v62 }
 0x4c7   : > { %v1695_v45 = vadd.f32 %v2803_v41, %v1672_v63  ;;  %v1649_v31 = vmax.f32 %v1647_v16, %v1648_v30  ;;  %v1644_v47 = vmax.f32 %v1642_v20, %v1643_v42  ;;  %v1757_v12 = vrot.slane %v1710_v52, 4 }
 0x4c9   : > { %v1650_v49 = vrot.slane %v1649_v31, 1  ;;  %v1673_v51 = vmul.f32 %v2795_v11, %v1644_v47  ;;  %v1711_v9 = vmax.f32 %v1695_v45, 0.0 }
 0x4cb   : > { %v1651_v10 = vmax.f32 %v1649_v31, %v1650_v49  ;;  %v1696_v37 = vadd.f32 %v2803_v41, %v1673_v51  ;;  %v1759_v22 = vrot.slane %v1711_v9, 3 }
 0x4cd   : > { %v1674_v57 = vmul.f32 %v2795_v11, %v1651_v10  ;;  %v1712_v59 = vmax.f32 %v1696_v37, 0.0  ;;  %v1758_v11 = vsel %vm1740_vm10, %v1757_v12, %v1756_v1 }
 0x4ce   : > { %v1760_v61 = vsel %vm1743_vm11, %v1759_v22, %v1758_v11 }
 0x4cf   : > { %v1697_v0 = vadd.f32 %v2803_v41, %v1674_v57  ;;  %v1761_v24 = vrot.slane %v1712_v59, 2 }
 0x4d1   : > { %v1713_v27 = vmax.f32 %v1697_v0, 0.0  ;;  %v1762_v41 = vsel %vm1746_vm12, %v1761_v24, %v1760_v61 }
 0x4d3   : > { %v1763_v56 = vrot.slane %v1713_v27, 1 }
 0x4d5   : > { %v1764_v29 = vsel %vm1749_vm13, %v1763_v56, %v1762_v41 }
 0x4d6   : > { %1768 = vst.msk [vmem:[%s2834_s14 + $0x8] sm:$0xff] %vm1539_vm6, %v1764_v29 }
 0x4d7   : > { %2238 = shalt.err (!%p2235_p3)
}
 0x4d8   : > { %s2239_s28 = scalar_lea.hbm %s2867_s23, 256  ;;  %s2243_s16 = scalar_lea.hbm %s2926_s9, 512 }
 0x4d9   : > { %p2240_p4 = scmp.ne.s32.totalorder %s2867_s23, %s2239_s28  ;;  %p2244_p9 = scmp.lt.s32.totalorder %s2867_s23, %s2926_s9 }
 0x4da   : > { %p2245_p10 = scmp.lt.s32.totalorder %s2243_s16, %s2239_s28 }
 0x4db   : > { %p2241_p7 = pnand %p2240_p4, %p2380_p5 }
 0x4dc   : > { %p2246_p11 = por %p2245_p10, %p2244_p9 }
 0x4dd   : > { %p2242_p8 = pneg %p2241_p7 }
 0x4df   : > { %p2247_p12 = pnand %p2246_p11, %p2242_p8 }
 0x4e1   : > { %2250 = shalt.err (!%p2247_p12)
}
 0x4e2   : > { %s2290_s24 = smov 128   ;;  %s2291_s25 = smov 8  }
 0x4e3   : > { %2081 = dma.vmem_to_hbm [thread:$0]  (%p2380_p5), %s2869_s17, 256, %s2867_s23, %s2877_s13, %s2290_s24, %s2290_s24, %s2291_s25  }
 0x4e4 PF: > { %p2087_p13 = scmp.ge.s32.totalorder %s2285_s12, 2  ;;  %s1798_s26 = sand.u32 1, %s2273_s30  }
 0x4e5   : > { %s1799_s27 = scalar_lea.sflag [#allocation3], %s1798_s26 }
 0x4e6   : > { %p2084_p0 = pnand %p2087_p13, %p2384_p6 }
 0x4e8   : > { %p2085_p1 = pneg %p2084_p0 }
 0x4ea   : > { %2268 = dma.done.wait (%p2085_p1), %s1799_s27, 256  }
 0x4eb   : > { %2270 = vsyncadd (%p2085_p1), %s1799_s27, 4294967040  ;;  %p19_p2 = scmp.ge.s32.totalorder %s2367_s15, 4   ;;  %s2929_s30 = smov %s2277_s10 }
 0x4ec   : > { %s2930_s10 = smov %s2281_s11  ;;  %s2931_s11 = smov %s2378_s18 }
 0x4ed   : > { %s2932_s12 = smov %s2367_s15  ;;  %21 = sbr.rel (!%p19_p2) target bundleno = 3 (0x3), region = 91 }
 0x4f2   :  { %1804 = vsyncpa [#allocation3], 1 }
 0x4f3   :  { %1806 = vsyncpa [#allocation3 + $0x1], 1 }

</bundles_post_ra>
